<compile_context>
chip_gen: v6e
topology: v6e:2x2x1
jax: 0.10.0
libtpu: 0.0.40
codegen_flags: <defaults>
</compile_context>

<pallas_src>
import functools

import jax
import jax.numpy as jnp
from jax.experimental import pallas as pl
from jax.experimental.pallas import tpu as pltpu

LN_EPS = 1e-5
MXU_DTYPE = jnp.bfloat16          # operand dtype for MXU matmuls (f32 accumulate)
ACT_DTYPE = jnp.bfloat16          # activation dtype at kernel (HBM) boundaries
NEG_INF = -1e30


def _vmem_limit_bytes():
    """Generation-aware scoped-VMEM limit (~75% of physical, capped)."""
    cap = 128 * 1024 * 1024
    try:
        info = pltpu.get_tpu_info()
        cap = int(getattr(info, "vmem_capacity_bytes", cap))
    except Exception:
        pass
    return int(min((cap * 3) // 4, 100 * 1024 * 1024))


VMEM_LIMIT = _vmem_limit_bytes()


def _layernorm(x, gamma, beta):
    mu = jnp.mean(x, axis=-1, keepdims=True)
    xc = x - mu
    var = jnp.mean(xc * xc, axis=-1, keepdims=True)
    return xc * jax.lax.rsqrt(var + LN_EPS) * gamma + beta


# ----------------------------------------------------------------------------
# Fused (pre-LayerNorm + multi-head attention + output proj + residual) kernel.
# Grid = (scale, batch, q_tile).  Key-padding / query lengths arrive via
# scalar prefetch.  K/V are computed once per (scale, batch) into VMEM scratch.
# ----------------------------------------------------------------------------
def _attn_kernel(kvlen_ref, qlen_ref, x_ref, kv_ref, qpos_ref, kpos_ref,
                 g_ref, b_ref,
                 wq_ref, wk_ref, wv_ref, wo_ref,
                 bq_ref, bk_ref, bv_ref, bo_ref,
                 out_ref, kt_scr, v_scr, o_scr, *, nhead, self_attn):
    s_idx = pl.program_id(0)
    t_idx = pl.program_id(2)
    tq, d = x_ref.shape
    nk = kv_ref.shape[0]
    hd = d // nhead
    scale = 1.0 / float(hd) ** 0.5
    cd = wq_ref.dtype                         # MXU operand dtype (bf16)

    # Skip q tiles that lie entirely in the per-scale padding region.
    @pl.when(t_idx * tq < qlen_ref[s_idx])
    def _():
        gamma = g_ref[...]
        beta = b_ref[...]

        # K/V are shared by every q tile of this (scale, batch): compute them
        # once (first q tile) into VMEM scratch and reuse for t > 0.  The
        # q-tile axis is "arbitrary" so the scratch legitimately carries.
        @pl.when(t_idx == 0)
        def _():
            kv = kv_ref[...].astype(jnp.float32)          # (Nk, d)
            if self_attn:
                xk = _layernorm(kv, gamma, beta)
                k_src = xk + kpos_ref[...].astype(jnp.float32)
                v_src = xk
            else:
                k_src = kv + kpos_ref[...].astype(jnp.float32)
                v_src = kv
            k = jnp.dot(k_src.astype(cd), wk_ref[...],
                        preferred_element_type=jnp.float32) + bk_ref[...]
            v = jnp.dot(v_src.astype(cd), wv_ref[...],
                        preferred_element_type=jnp.float32) + bv_ref[...]
            # one amortized transpose instead of per-head dot_general transposes
            kt_scr[...] = jnp.transpose(k).astype(cd)     # (d, Nk)
            v_scr[...] = v.astype(cd)                     # (Nk, d)

        # pre-norm (norm1 for self-attn, norm2 for cross-attn); f32 math
        x = x_ref[...].astype(jnp.float32)                # (TQ, d) residual tile
        xq = _layernorm(x, gamma, beta)
        q_src = xq + qpos_ref[...].astype(jnp.float32)
        q = jnp.dot(q_src.astype(cd), wq_ref[...],
                    preferred_element_type=jnp.float32) + bq_ref[...]
        q = (q * scale).astype(cd)            # fold 1/sqrt(hd) into q

        # additive key-padding bias, shared across heads
        klen = kvlen_ref[s_idx]
        kbias = jnp.where(
            jax.lax.broadcasted_iota(jnp.int32, (1, nk), 1) < klen,
            0.0, NEG_INF).astype(jnp.float32)

        kt = kt_scr[...]                      # (d, Nk) bf16
        v = v_scr[...]                        # (Nk, d) bf16

        # Per-head scores / softmax / PV.  Heavy projections are hoisted out;
        # per-head results land in a lane-dense (TQ, d) scratch (no concat).
        for h in range(nhead):
            sl = slice(h * hd, (h + 1) * hd)
            s = jnp.dot(q[:, sl], kt[sl, :], preferred_element_type=jnp.float32)
            s = s + kbias
            s = s - jnp.max(s, axis=-1, keepdims=True)
            p = jnp.exp(s)
            p = p * pl.reciprocal(jnp.sum(p, axis=-1, keepdims=True), approx=True)
            o_scr[:, sl] = jnp.dot(p.astype(cd), v[:, sl],
                                   preferred_element_type=jnp.float32)

        attn = jnp.dot(o_scr[...].astype(cd), wo_ref[...],
                       preferred_element_type=jnp.float32) + bo_ref[...]
        out_ref[...] = (x + attn).astype(out_ref.dtype)   # residual (dropout=id)


def _mha(q4, kv4, qpos4, kpos4, kvlen, qlen, ln_p, attn_p, nhead, *,
         self_attn, out_dtype):
    """q4/qpos4: (S,B,Nq,d);  kv4/kpos4: (S,B,Nk,d);  kvlen/qlen: (S,) int32."""
    S, B, Nq, d = q4.shape
    Nk = kv4.shape[2]
    TQ = Nq if Nq <= 256 else 256             # fatter M keeps the MXU fuller
    QT = pl.cdiv(Nq, TQ)

    kernel = functools.partial(_attn_kernel, nhead=nhead, self_attn=self_attn)

    q_spec = pl.BlockSpec((None, None, TQ, d), lambda s, b, t, kvl, ql: (s, b, t, 0))
    k_spec = pl.BlockSpec((None, None, Nk, d), lambda s, b, t, kvl, ql: (s, b, 0, 0))
    vec_d = pl.BlockSpec((1, d), lambda s, b, t, kvl, ql: (0, 0))
    mat_dd = pl.BlockSpec((d, d), lambda s, b, t, kvl, ql: (0, 0))

    gs = pltpu.PrefetchScalarGridSpec(
        num_scalar_prefetch=2,
        grid=(S, B, QT),
        in_specs=[q_spec, k_spec, q_spec, k_spec,
                  vec_d, vec_d,
                  mat_dd, mat_dd, mat_dd, mat_dd,
                  vec_d, vec_d, vec_d, vec_d],
        out_specs=q_spec,
        scratch_shapes=[pltpu.VMEM((d, Nk), MXU_DTYPE),    # K^T (per scale/batch)
                        pltpu.VMEM((Nk, d), MXU_DTYPE),    # V
                        pltpu.VMEM((TQ, d), jnp.float32)], # per-head outputs
    )
    return pl.pallas_call(
        kernel,
        out_shape=jax.ShapeDtypeStruct((S, B, Nq, d), out_dtype),
        grid_spec=gs,
        compiler_params=pltpu.CompilerParams(
            # q-tile axis carries the K/V scratch -> "arbitrary"
            dimension_semantics=("parallel", "parallel", "arbitrary"),
            vmem_limit_bytes=VMEM_LIMIT),
    )(kvlen, qlen,
      q4, kv4, qpos4, kpos4,
      ln_p["gamma"], ln_p["beta"],
      attn_p["wq"].astype(MXU_DTYPE), attn_p["wk"].astype(MXU_DTYPE),
      attn_p["wv"].astype(MXU_DTYPE), attn_p["wo"].astype(MXU_DTYPE),
      attn_p["bq"], attn_p["bk"], attn_p["bv"], attn_p["bo"])


# ----------------------------------------------------------------------------
# Fused (norm3 + Linear -> GELU -> Linear + residual) feed-forward kernel,
# row-tiled over the flattened (B*N) token axis; weights stay resident.
# ----------------------------------------------------------------------------
def _ffn_kernel(x_ref, g_ref, b_ref, w1_ref, b1_ref, w2_ref, b2_ref, out_ref):
    x = x_ref[...].astype(jnp.float32)                    # (TM, d)
    x2 = _layernorm(x, g_ref[...], b_ref[...])
    cd = w1_ref.dtype
    h = jnp.dot(x2.astype(cd), w1_ref[...],
                preferred_element_type=jnp.float32) + b1_ref[...]
    # TODO(synk): nn.GELU() default is exact erf-GELU; tanh-approx used here
    # (Mosaic-safe lowering; ~1e-3 numeric drift).
    h = 0.5 * h * (1.0 + jnp.tanh(0.7978845608028654 * (h + 0.044715 * h * h * h)))
    y = jnp.dot(h.astype(cd), w2_ref[...],
                preferred_element_type=jnp.float32) + b2_ref[...]
    out_ref[...] = (x + y).astype(out_ref.dtype)          # residual (dropout = id)


def _ffn(x, ln_p, ff_p, *, out_dtype):
    B, N, d = x.shape
    R = B * N
    dff = ff_p["w1"].shape[1]
    # Bigger row tiles amortize the per-grid-step overhead (256 -> ~63% of HBM
    # roofline, 512 -> ~85%).  For very large dff on v7x an inner dff grid axis
    # would be needed; not required at these sizes.
    TM = R if R <= 512 else 512
    xf = x.reshape(R, d)
    out = pl.pallas_call(
        _ffn_kernel,
        out_shape=jax.ShapeDtypeStruct((R, d), out_dtype),
        grid=(pl.cdiv(R, TM),),
        in_specs=[pl.BlockSpec((TM, d), lambda i: (i, 0)),
                  pl.BlockSpec((1, d), lambda i: (0, 0)),
                  pl.BlockSpec((1, d), lambda i: (0, 0)),
                  pl.BlockSpec((d, dff), lambda i: (0, 0)),
                  pl.BlockSpec((1, dff), lambda i: (0, 0)),
                  pl.BlockSpec((dff, d), lambda i: (0, 0)),
                  pl.BlockSpec((1, d), lambda i: (0, 0))],
        out_specs=pl.BlockSpec((TM, d), lambda i: (i, 0)),
        compiler_params=pltpu.CompilerParams(
            dimension_semantics=("parallel",),
            vmem_limit_bytes=VMEM_LIMIT),
    )(xf, ln_p["gamma"], ln_p["beta"],
      ff_p["w1"].astype(MXU_DTYPE), ff_p["b1"],
      ff_p["w2"].astype(MXU_DTYPE), ff_p["b2"])
    return out.reshape(B, N, d)


# ----------------------------------------------------------------------------
# Full MSDecoderLayer.forward
# ----------------------------------------------------------------------------
def ms_decoder_layer_forward(params, tgt, memory,
                             tgt_mask=None, memory_mask=None,
                             pos=None, query_pos=None):
    # TODO(synk): att_mask path of `Attention` not implementable without its source.
    assert tgt_mask is None and memory_mask is None
    nhead = params["nhead"]

    multi_scale = isinstance(tgt, (list, tuple))
    if multi_scale:
        q_lens = [t.shape[1] for t in tgt]
        tgt_cat = jnp.concatenate(list(tgt), axis=1)
    else:
        q_lens = [tgt.shape[1]] * len(memory)
        tgt_cat = tgt

    B, Ntot, d = tgt_cat.shape
    out_dtype = tgt_cat.dtype
    qpos_full = query_pos if query_pos is not None else jnp.zeros_like(tgt_cat)

    # ---- self-attention block (norm1 + MHA + residual), one fused kernel;
    #      intermediate activations carried bf16 (bandwidth-bound regime).
    len_self = jnp.array([Ntot], jnp.int32)
    tgt_cat = _mha(tgt_cat[None], tgt_cat[None], qpos_full[None], qpos_full[None],
                   len_self, len_self, params["norm1"], params["self_attn"], nhead,
                   self_attn=True, out_dtype=ACT_DTYPE)[0]

    # ---- split queries (and query_pos, per-scale) for cross-attention
    S = len(memory)
    if pos is None:
        pos = [None] * S
    offs = [0]
    for l in q_lens:
        offs.append(offs[-1] + l)
    if multi_scale:
        q_parts = [tgt_cat[:, offs[i]:offs[i + 1]] for i in range(S)]
        qpos_parts = [qpos_full[:, offs[i]:offs[i + 1]] for i in range(S)]
    else:
        q_parts = [tgt_cat] * S
        qpos_parts = [qpos_full] * S

    # ---- cross-attention: all scales merged into ONE gridded kernel.
    #      Scales are padded to (nq_max, nk_max) in bf16; true lengths travel
    #      via scalar prefetch (key-padding bias + padded-q-tile skip).
    #      (Fully ragged un-padded indexing left as a future improvement.)
    nq_max = max(p.shape[1] for p in q_parts)
    nk_max = max(m.shape[1] for m in memory)

    def pad_rows(a, n):
        a = a.astype(ACT_DTYPE)
        if a.shape[1] == n:
            return a
        return jnp.pad(a, ((0, 0), (0, n - a.shape[1]), (0, 0)))

    q4 = jnp.stack([pad_rows(p, nq_max) for p in q_parts], axis=0)
    qpos4 = jnp.stack([pad_rows(p, nq_max) for p in qpos_parts], axis=0)
    kv4 = jnp.stack([pad_rows(m, nk_max) for m in memory], axis=0)
    kpos4 = jnp.stack(
        [pad_rows(p if p is not None else jnp.zeros_like(m), nk_max)
         for p, m in zip(pos, memory)], axis=0)
    kvlen = jnp.array([m.shape[1] for m in memory], jnp.int32)
    qlen = jnp.array([p.shape[1] for p in q_parts], jnp.int32)

    x4 = _mha(q4, kv4, qpos4, kpos4, kvlen, qlen,
              params["norm2"], params["cross_attn"], nhead,
              self_attn=False, out_dtype=ACT_DTYPE)

    cross_lens = [p.shape[1] for p in q_parts]
    tgt_cat = jnp.concatenate([x4[i, :, :cross_lens[i]] for i in range(S)], axis=1)

    # ---- feed-forward block (norm3 + MLP + residual), fused, row-tiled
    tgt_cat = _ffn(tgt_cat, params["norm3"], params["ff"], out_dtype=out_dtype)

    offs2 = [0]
    for l in cross_lens:
        offs2.append(offs2[-1] + l)
    return [tgt_cat[:, offs2[i]:offs2[i + 1]] for i in range(S)]


# ----------------------------------------------------------------------------
# Deterministic parameter initialization (synthetic weights).
# ----------------------------------------------------------------------------
def init_params(key, d_model, nhead, dim_feedforward):
    ks = jax.random.split(key, 10)

    def lin(k, fan_in, fan_out):
        kw, kb = jax.random.split(k)
        w = 0.02 * jax.random.normal(kw, (fan_in, fan_out), jnp.float32)
        b = 0.01 * jax.random.normal(kb, (1, fan_out), jnp.float32)
        return w, b

    def attn_params(k):
        k1, k2, k3, k4 = jax.random.split(k, 4)
        wq, bq = lin(k1, d_model, d_model)
        wk, bk = lin(k2, d_model, d_model)
        wv, bv = lin(k3, d_model, d_model)
        wo, bo = lin(k4, d_model, d_model)
        return dict(wq=wq, bq=bq, wk=wk, bk=bk, wv=wv, bv=bv, wo=wo, bo=bo)

    def ln_params():
        return dict(gamma=jnp.ones((1, d_model), jnp.float32),
                    beta=jnp.zeros((1, d_model), jnp.float32))

    w1, b1 = lin(ks[2], d_model, dim_feedforward)
    w2, b2 = lin(ks[3], dim_feedforward, d_model)

    return dict(
        nhead=nhead,
        self_attn=attn_params(ks[0]),
        cross_attn=attn_params(ks[1]),
        ff=dict(w1=w1, b1=b1, w2=w2, b2=b2),
        norm1=ln_params(), norm2=ln_params(), norm3=ln_params(),
    )


if __name__ == "__main__":
    # d_model is lane-dense (multiple of 128) per review; shapes stay small.
    B, d_model, nhead, dff = 2, 128, 4, 256
    key = jax.random.PRNGKey(0)
    kp, k1, k2, k3, k4, k5, k6 = jax.random.split(key, 7)

    params = init_params(kp, d_model, nhead, dff)

    # two scales: tgt [B, Nq_i, d], memory [B, Nkv_i, d] (ragged across scales)
    tgt = [jax.random.normal(k1, (B, 8, d_model), jnp.float32),
           jax.random.normal(k2, (B, 8, d_model), jnp.float32)]
    memory = [jax.random.normal(k3, (B, 16, d_model), jnp.float32),
              jax.random.normal(k4, (B, 8, d_model), jnp.float32)]
    # exercise positional-embedding paths (incl. per-scale query_pos slicing)
    query_pos = 0.1 * jax.random.normal(k5, (B, 16, d_model), jnp.float32)
    pos = [0.1 * jax.random.normal(k6, (B, 16, d_model), jnp.float32), None]

    out = ms_decoder_layer_forward(params, tgt, memory, pos=pos, query_pos=query_pos)
    out = jax.block_until_ready(out)

    assert len(out) == len(tgt)
    assert all(o.shape == t.shape for o, t in zip(out, tgt))
    assert all(bool(jnp.all(jnp.isfinite(o))) for o in out)
    print("KERNEL_OK")
</pallas_src>

<mosaic_0001>
module attributes {stable_mosaic.version = 11 : i64} {
  func.func @_attn_kernel(%arg0: i32, %arg1: i32, %arg2: i32, %arg3: memref<1xi32, #tpu.memory_space<smem>>, %arg4: memref<1xi32, #tpu.memory_space<smem>>, %arg5: memref<1x1x16x128xf32, #tpu.memory_space<vmem>>, %arg6: memref<1x1x16x128xf32, #tpu.memory_space<vmem>>, %arg7: memref<1x1x16x128xf32, #tpu.memory_space<vmem>>, %arg8: memref<1x1x16x128xf32, #tpu.memory_space<vmem>>, %arg9: memref<1x128xf32, #tpu.memory_space<vmem>>, %arg10: memref<1x128xf32, #tpu.memory_space<vmem>>, %arg11: memref<128x128xbf16, #tpu.memory_space<vmem>>, %arg12: memref<128x128xbf16, #tpu.memory_space<vmem>>, %arg13: memref<128x128xbf16, #tpu.memory_space<vmem>>, %arg14: memref<128x128xbf16, #tpu.memory_space<vmem>>, %arg15: memref<1x128xf32, #tpu.memory_space<vmem>>, %arg16: memref<1x128xf32, #tpu.memory_space<vmem>>, %arg17: memref<1x128xf32, #tpu.memory_space<vmem>>, %arg18: memref<1x128xf32, #tpu.memory_space<vmem>>, %arg19: memref<1x1x16x128xbf16, #tpu.memory_space<vmem>>, %arg20: memref<128x16xbf16, #tpu.memory_space<vmem>>, %arg21: memref<16x128xbf16, #tpu.memory_space<vmem>>, %arg22: memref<16x128xf32, #tpu.memory_space<vmem>>) attributes {dimension_semantics = [#tpu.dimension_semantics<parallel>, #tpu.dimension_semantics<parallel>, #tpu.dimension_semantics<arbitrary>], iteration_bounds = array<i64: 1, 2, 1>, scalar_prefetch = 2 : i64, scratch_operands = 3 : i64, tpu.core_type = #tpu.core_type<tc>, window_params = [{transform_indices = @transform_0, window_bounds = array<i64: 1, 1, 16, 128>}, {transform_indices = @transform_1, window_bounds = array<i64: 1, 1, 16, 128>}, {transform_indices = @transform_2, window_bounds = array<i64: 1, 1, 16, 128>}, {transform_indices = @transform_3, window_bounds = array<i64: 1, 1, 16, 128>}, {pipeline_mode = #tpu.pipeline_mode<synchronous>, transform_indices = @transform_4, window_bounds = array<i64: 1, 128>}, {pipeline_mode = #tpu.pipeline_mode<synchronous>, transform_indices = @transform_5, window_bounds = array<i64: 1, 128>}, {pipeline_mode = #tpu.pipeline_mode<synchronous>, transform_indices = @transform_6, window_bounds = array<i64: 128, 128>}, {pipeline_mode = #tpu.pipeline_mode<synchronous>, transform_indices = @transform_7, window_bounds = array<i64: 128, 128>}, {pipeline_mode = #tpu.pipeline_mode<synchronous>, transform_indices = @transform_8, window_bounds = array<i64: 128, 128>}, {pipeline_mode = #tpu.pipeline_mode<synchronous>, transform_indices = @transform_9, window_bounds = array<i64: 128, 128>}, {pipeline_mode = #tpu.pipeline_mode<synchronous>, transform_indices = @transform_10, window_bounds = array<i64: 1, 128>}, {pipeline_mode = #tpu.pipeline_mode<synchronous>, transform_indices = @transform_11, window_bounds = array<i64: 1, 128>}, {pipeline_mode = #tpu.pipeline_mode<synchronous>, transform_indices = @transform_12, window_bounds = array<i64: 1, 128>}, {pipeline_mode = #tpu.pipeline_mode<synchronous>, transform_indices = @transform_13, window_bounds = array<i64: 1, 128>}, {transform_indices = @transform_14, window_bounds = array<i64: 1, 1, 16, 128>}]} {
    %c16_i32 = arith.constant 16 : i32
    %0 = arith.muli %arg2, %c16_i32 : i32
    %1 = arith.index_cast %arg0 : i32 to index
    %2 = memref.load %arg4[%1] : memref<1xi32, #tpu.memory_space<smem>>
    %3 = arith.cmpi slt, %0, %2 : i32
    %4 = arith.extui %3 : i1 to i32
    %c0_i32 = arith.constant 0 : i32
    %5 = arith.cmpi ne, %4, %c0_i32 : i32
    scf.if %5 {
      %c0 = arith.constant 0 : index
      %c0_0 = arith.constant 0 : index
      %6 = vector.load %arg9[%c0, %c0_0] : memref<1x128xf32, #tpu.memory_space<vmem>>, vector<1x128xf32>
      %c0_1 = arith.constant 0 : index
      %c0_2 = arith.constant 0 : index
      %7 = vector.load %arg10[%c0_1, %c0_2] : memref<1x128xf32, #tpu.memory_space<vmem>>, vector<1x128xf32>
      %c0_i32_3 = arith.constant 0 : i32
      %8 = arith.cmpi eq, %arg2, %c0_i32_3 : i32
      %9 = arith.extui %8 : i1 to i32
      %c0_i32_4 = arith.constant 0 : i32
      %10 = arith.cmpi ne, %9, %c0_i32_4 : i32
      scf.if %10 {
        %c0_61 = arith.constant 0 : index
        %c0_62 = arith.constant 0 : index
        %c0_63 = arith.constant 0 : index
        %c0_64 = arith.constant 0 : index
        %143 = vector.load %arg6[%c0_61, %c0_62, %c0_63, %c0_64] : memref<1x1x16x128xf32, #tpu.memory_space<vmem>>, vector<1x1x16x128xf32>
        %144 = vector.shape_cast %143 : vector<1x1x16x128xf32> to vector<16x128xf32>
        %cst_65 = arith.constant dense<0.000000e+00> : vector<16xf32>
        %145 = vector.multi_reduction <add>, %144, %cst_65 [1] : vector<16x128xf32> to vector<16xf32>
        %146 = vector.shape_cast %145 : vector<16xf32> to vector<16x1xf32>
        %cst_66 = arith.constant 1.280000e+02 : f32
        %147 = vector.broadcast %cst_66 : f32 to vector<16x1xf32>
        %148 = arith.divf %146, %147 : vector<16x1xf32>
        %149 = vector.broadcast %148 : vector<16x1xf32> to vector<16x128xf32>
        %150 = arith.subf %144, %149 : vector<16x128xf32>
        %151 = arith.mulf %150, %150 : vector<16x128xf32>
        %cst_67 = arith.constant dense<0.000000e+00> : vector<16xf32>
        %152 = vector.multi_reduction <add>, %151, %cst_67 [1] : vector<16x128xf32> to vector<16xf32>
        %153 = vector.shape_cast %152 : vector<16xf32> to vector<16x1xf32>
        %cst_68 = arith.constant 1.280000e+02 : f32
        %154 = vector.broadcast %cst_68 : f32 to vector<16x1xf32>
        %155 = arith.divf %153, %154 : vector<16x1xf32>
        %cst_69 = arith.constant 9.99999974E-6 : f32
        %156 = vector.broadcast %cst_69 : f32 to vector<16x1xf32>
        %157 = arith.addf %155, %156 : vector<16x1xf32>
        %158 = math.rsqrt %157 : vector<16x1xf32>
        %159 = vector.broadcast %158 : vector<16x1xf32> to vector<16x128xf32>
        %160 = arith.mulf %150, %159 : vector<16x128xf32>
        %161 = vector.broadcast %6 : vector<1x128xf32> to vector<16x128xf32>
        %162 = arith.mulf %160, %161 : vector<16x128xf32>
        %163 = vector.broadcast %7 : vector<1x128xf32> to vector<16x128xf32>
        %164 = arith.addf %162, %163 : vector<16x128xf32>
        %c0_70 = arith.constant 0 : index
        %c0_71 = arith.constant 0 : index
        %c0_72 = arith.constant 0 : index
        %c0_73 = arith.constant 0 : index
        %165 = vector.load %arg8[%c0_70, %c0_71, %c0_72, %c0_73] : memref<1x1x16x128xf32, #tpu.memory_space<vmem>>, vector<1x1x16x128xf32>
        %166 = vector.shape_cast %165 : vector<1x1x16x128xf32> to vector<16x128xf32>
        %167 = arith.addf %164, %166 : vector<16x128xf32>
        %168 = arith.truncf %167 : vector<16x128xf32> to vector<16x128xbf16>
        %c0_74 = arith.constant 0 : index
        %c0_75 = arith.constant 0 : index
        %169 = vector.load %arg12[%c0_74, %c0_75] : memref<128x128xbf16, #tpu.memory_space<vmem>>, vector<128x128xbf16>
        %cst_76 = arith.constant dense<0.000000e+00> : vector<16x128xf32>
        %170 = tpu.matmul %168, %169, %cst_76 {dimension_numbers = #tpu.dot_dimension_numbers<[1], [0], [0], [1], [0, 0, 1, 1], [], []>} : vector<16x128xbf16>, vector<128x128xbf16>, vector<16x128xf32> -> vector<16x128xf32>
        %c0_77 = arith.constant 0 : index
        %c0_78 = arith.constant 0 : index
        %171 = vector.load %arg16[%c0_77, %c0_78] : memref<1x128xf32, #tpu.memory_space<vmem>>, vector<1x128xf32>
        %172 = vector.broadcast %171 : vector<1x128xf32> to vector<16x128xf32>
        %173 = arith.addf %170, %172 : vector<16x128xf32>
        %174 = arith.truncf %164 : vector<16x128xf32> to vector<16x128xbf16>
        %c0_79 = arith.constant 0 : index
        %c0_80 = arith.constant 0 : index
        %175 = vector.load %arg13[%c0_79, %c0_80] : memref<128x128xbf16, #tpu.memory_space<vmem>>, vector<128x128xbf16>
        %cst_81 = arith.constant dense<0.000000e+00> : vector<16x128xf32>
        %176 = tpu.matmul %174, %175, %cst_81 {dimension_numbers = #tpu.dot_dimension_numbers<[1], [0], [0], [1], [0, 0, 1, 1], [], []>} : vector<16x128xbf16>, vector<128x128xbf16>, vector<16x128xf32> -> vector<16x128xf32>
        %c0_82 = arith.constant 0 : index
        %c0_83 = arith.constant 0 : index
        %177 = vector.load %arg17[%c0_82, %c0_83] : memref<1x128xf32, #tpu.memory_space<vmem>>, vector<1x128xf32>
        %178 = vector.broadcast %177 : vector<1x128xf32> to vector<16x128xf32>
        %179 = arith.addf %176, %178 : vector<16x128xf32>
        %180 = tpu.transpose %173, [1, 0] : vector<16x128xf32> -> vector<128x16xf32>
        %181 = arith.truncf %180 : vector<128x16xf32> to vector<128x16xbf16>
        %c0_84 = arith.constant 0 : index
        %c0_85 = arith.constant 0 : index
        %182 = vector.load %arg20[%c0_84, %c0_85] : memref<128x16xbf16, #tpu.memory_space<vmem>>, vector<128x16xbf16>
        tpu.vector_store %arg20[%c0_84, %c0_85], %181 {strides = array<i32>} : memref<128x16xbf16, #tpu.memory_space<vmem>>, vector<128x16xbf16>,
        %183 = arith.truncf %179 : vector<16x128xf32> to vector<16x128xbf16>
        %c0_86 = arith.constant 0 : index
        %c0_87 = arith.constant 0 : index
        %184 = vector.load %arg21[%c0_86, %c0_87] : memref<16x128xbf16, #tpu.memory_space<vmem>>, vector<16x128xbf16>
        tpu.vector_store %arg21[%c0_86, %c0_87], %183 {strides = array<i32>} : memref<16x128xbf16, #tpu.memory_space<vmem>>, vector<16x128xbf16>,
      } else {
      }
      %c0_5 = arith.constant 0 : index
      %c0_6 = arith.constant 0 : index
      %c0_7 = arith.constant 0 : index
      %c0_8 = arith.constant 0 : index
      %11 = vector.load %arg5[%c0_5, %c0_6, %c0_7, %c0_8] : memref<1x1x16x128xf32, #tpu.memory_space<vmem>>, vector<1x1x16x128xf32>
      %12 = vector.shape_cast %11 : vector<1x1x16x128xf32> to vector<16x128xf32>
      %cst = arith.constant dense<0.000000e+00> : vector<16xf32>
      %13 = vector.multi_reduction <add>, %12, %cst [1] : vector<16x128xf32> to vector<16xf32>
      %14 = vector.shape_cast %13 : vector<16xf32> to vector<16x1xf32>
      %cst_9 = arith.constant 1.280000e+02 : f32
      %15 = vector.broadcast %cst_9 : f32 to vector<16x1xf32>
      %16 = arith.divf %14, %15 : vector<16x1xf32>
      %17 = vector.broadcast %16 : vector<16x1xf32> to vector<16x128xf32>
      %18 = arith.subf %12, %17 : vector<16x128xf32>
      %19 = arith.mulf %18, %18 : vector<16x128xf32>
      %cst_10 = arith.constant dense<0.000000e+00> : vector<16xf32>
      %20 = vector.multi_reduction <add>, %19, %cst_10 [1] : vector<16x128xf32> to vector<16xf32>
      %21 = vector.shape_cast %20 : vector<16xf32> to vector<16x1xf32>
      %cst_11 = arith.constant 1.280000e+02 : f32
      %22 = vector.broadcast %cst_11 : f32 to vector<16x1xf32>
      %23 = arith.divf %21, %22 : vector<16x1xf32>
      %cst_12 = arith.constant 9.99999974E-6 : f32
      %24 = vector.broadcast %cst_12 : f32 to vector<16x1xf32>
      %25 = arith.addf %23, %24 : vector<16x1xf32>
      %26 = math.rsqrt %25 : vector<16x1xf32>
      %27 = vector.broadcast %26 : vector<16x1xf32> to vector<16x128xf32>
      %28 = arith.mulf %18, %27 : vector<16x128xf32>
      %29 = vector.broadcast %6 : vector<1x128xf32> to vector<16x128xf32>
      %30 = arith.mulf %28, %29 : vector<16x128xf32>
      %31 = vector.broadcast %7 : vector<1x128xf32> to vector<16x128xf32>
      %32 = arith.addf %30, %31 : vector<16x128xf32>
      %c0_13 = arith.constant 0 : index
      %c0_14 = arith.constant 0 : index
      %c0_15 = arith.constant 0 : index
      %c0_16 = arith.constant 0 : index
      %33 = vector.load %arg7[%c0_13, %c0_14, %c0_15, %c0_16] : memref<1x1x16x128xf32, #tpu.memory_space<vmem>>, vector<1x1x16x128xf32>
      %34 = vector.shape_cast %33 : vector<1x1x16x128xf32> to vector<16x128xf32>
      %35 = arith.addf %32, %34 : vector<16x128xf32>
      %36 = arith.truncf %35 : vector<16x128xf32> to vector<16x128xbf16>
      %c0_17 = arith.constant 0 : index
      %c0_18 = arith.constant 0 : index
      %37 = vector.load %arg11[%c0_17, %c0_18] : memref<128x128xbf16, #tpu.memory_space<vmem>>, vector<128x128xbf16>
      %cst_19 = arith.constant dense<0.000000e+00> : vector<16x128xf32>
      %38 = tpu.matmul %36, %37, %cst_19 {dimension_numbers = #tpu.dot_dimension_numbers<[1], [0], [0], [1], [0, 0, 1, 1], [], []>} : vector<16x128xbf16>, vector<128x128xbf16>, vector<16x128xf32> -> vector<16x128xf32>
      %c0_20 = arith.constant 0 : index
      %c0_21 = arith.constant 0 : index
      %39 = vector.load %arg15[%c0_20, %c0_21] : memref<1x128xf32, #tpu.memory_space<vmem>>, vector<1x128xf32>
      %40 = vector.broadcast %39 : vector<1x128xf32> to vector<16x128xf32>
      %41 = arith.addf %38, %40 : vector<16x128xf32>
      %cst_22 = arith.constant 0.176776692 : f32
      %42 = vector.broadcast %cst_22 : f32 to vector<16x128xf32>
      %43 = arith.mulf %41, %42 : vector<16x128xf32>
      %44 = arith.truncf %43 : vector<16x128xf32> to vector<16x128xbf16>
      %45 = arith.index_cast %arg0 : i32 to index
      %46 = memref.load %arg3[%45] : memref<1xi32, #tpu.memory_space<smem>>
      %47 = tpu.iota {dimensions = array<i32: 1>} : vector<1x16xi32>
      %48 = vector.broadcast %46 : i32 to vector<1x16xi32>
      %49 = arith.cmpi slt, %47, %48 : vector<1x16xi32>
      %cst_23 = arith.constant 0.000000e+00 : f32
      %cst_24 = arith.constant -1.000000e+30 : f32
      %50 = vector.broadcast %cst_23 : f32 to vector<1x16xf32>
      %51 = vector.broadcast %cst_24 : f32 to vector<1x16xf32>
      %52 = arith.select %49, %50, %51 : vector<1x16xi1>, vector<1x16xf32>
      %c0_25 = arith.constant 0 : index
      %c0_26 = arith.constant 0 : index
      %53 = vector.load %arg20[%c0_25, %c0_26] : memref<128x16xbf16, #tpu.memory_space<vmem>>, vector<128x16xbf16>
      %c0_27 = arith.constant 0 : index
      %c0_28 = arith.constant 0 : index
      %54 = vector.load %arg21[%c0_27, %c0_28] : memref<16x128xbf16, #tpu.memory_space<vmem>>, vector<16x128xbf16>
      %55 = vector.extract_strided_slice %44 {offsets = [0, 0], sizes = [16, 32], strides = [1, 1]} : vector<16x128xbf16> to vector<16x32xbf16>
      %56 = vector.extract_strided_slice %53 {offsets = [0, 0], sizes = [32, 16], strides = [1, 1]} : vector<128x16xbf16> to vector<32x16xbf16>
      %cst_29 = arith.constant dense<0.000000e+00> : vector<16x16xf32>
      %57 = tpu.matmul %55, %56, %cst_29 {dimension_numbers = #tpu.dot_dimension_numbers<[1], [0], [0], [1], [0, 0, 1, 1], [], []>} : vector<16x32xbf16>, vector<32x16xbf16>, vector<16x16xf32> -> vector<16x16xf32>
      %58 = vector.broadcast %52 : vector<1x16xf32> to vector<16x16xf32>
      %59 = arith.addf %57, %58 : vector<16x16xf32>
      %cst_30 = arith.constant dense<0xFF800000> : vector<16xf32>
      %60 = vector.multi_reduction <maximumf>, %59, %cst_30 [1] : vector<16x16xf32> to vector<16xf32>
      %61 = vector.shape_cast %60 : vector<16xf32> to vector<16x1xf32>
      %62 = vector.broadcast %61 : vector<16x1xf32> to vector<16x16xf32>
      %63 = arith.subf %59, %62 : vector<16x16xf32>
      %64 = math.exp %63 : vector<16x16xf32>
      %cst_31 = arith.constant dense<0.000000e+00> : vector<16xf32>
      %65 = vector.multi_reduction <add>, %64, %cst_31 [1] : vector<16x16xf32> to vector<16xf32>
      %66 = vector.shape_cast %65 : vector<16xf32> to vector<16x1xf32>
      %67 = tpu.reciprocal %66 {approx = true} : vector<16x1xf32> -> vector<16x1xf32>
      %68 = vector.broadcast %67 : vector<16x1xf32> to vector<16x16xf32>
      %69 = arith.mulf %64, %68 : vector<16x16xf32>
      %70 = arith.truncf %69 : vector<16x16xf32> to vector<16x16xbf16>
      %71 = vector.extract_strided_slice %54 {offsets = [0, 0], sizes = [16, 32], strides = [1, 1]} : vector<16x128xbf16> to vector<16x32xbf16>
      %cst_32 = arith.constant dense<0.000000e+00> : vector<16x32xf32>
      %72 = tpu.matmul %70, %71, %cst_32 {dimension_numbers = #tpu.dot_dimension_numbers<[1], [0], [0], [1], [0, 0, 1, 1], [], []>} : vector<16x16xbf16>, vector<16x32xbf16>, vector<16x32xf32> -> vector<16x32xf32>
      %c0_33 = arith.constant 0 : index
      %c0_34 = arith.constant 0 : index
      %73 = vector.load %arg22[%c0_33, %c0_34] : memref<16x128xf32, #tpu.memory_space<vmem>>, vector<16x32xf32>
      tpu.vector_store %arg22[%c0_33, %c0_34], %72 {strides = array<i32>} : memref<16x128xf32, #tpu.memory_space<vmem>>, vector<16x32xf32>,
      %74 = vector.extract_strided_slice %44 {offsets = [0, 32], sizes = [16, 32], strides = [1, 1]} : vector<16x128xbf16> to vector<16x32xbf16>
      %75 = vector.extract_strided_slice %53 {offsets = [32, 0], sizes = [32, 16], strides = [1, 1]} : vector<128x16xbf16> to vector<32x16xbf16>
      %cst_35 = arith.constant dense<0.000000e+00> : vector<16x16xf32>
      %76 = tpu.matmul %74, %75, %cst_35 {dimension_numbers = #tpu.dot_dimension_numbers<[1], [0], [0], [1], [0, 0, 1, 1], [], []>} : vector<16x32xbf16>, vector<32x16xbf16>, vector<16x16xf32> -> vector<16x16xf32>
      %77 = vector.broadcast %52 : vector<1x16xf32> to vector<16x16xf32>
      %78 = arith.addf %76, %77 : vector<16x16xf32>
      %cst_36 = arith.constant dense<0xFF800000> : vector<16xf32>
      %79 = vector.multi_reduction <maximumf>, %78, %cst_36 [1] : vector<16x16xf32> to vector<16xf32>
      %80 = vector.shape_cast %79 : vector<16xf32> to vector<16x1xf32>
      %81 = vector.broadcast %80 : vector<16x1xf32> to vector<16x16xf32>
      %82 = arith.subf %78, %81 : vector<16x16xf32>
      %83 = math.exp %82 : vector<16x16xf32>
      %cst_37 = arith.constant dense<0.000000e+00> : vector<16xf32>
      %84 = vector.multi_reduction <add>, %83, %cst_37 [1] : vector<16x16xf32> to vector<16xf32>
      %85 = vector.shape_cast %84 : vector<16xf32> to vector<16x1xf32>
      %86 = tpu.reciprocal %85 {approx = true} : vector<16x1xf32> -> vector<16x1xf32>
      %87 = vector.broadcast %86 : vector<16x1xf32> to vector<16x16xf32>
      %88 = arith.mulf %83, %87 : vector<16x16xf32>
      %89 = arith.truncf %88 : vector<16x16xf32> to vector<16x16xbf16>
      %90 = vector.extract_strided_slice %54 {offsets = [0, 32], sizes = [16, 32], strides = [1, 1]} : vector<16x128xbf16> to vector<16x32xbf16>
      %cst_38 = arith.constant dense<0.000000e+00> : vector<16x32xf32>
      %91 = tpu.matmul %89, %90, %cst_38 {dimension_numbers = #tpu.dot_dimension_numbers<[1], [0], [0], [1], [0, 0, 1, 1], [], []>} : vector<16x16xbf16>, vector<16x32xbf16>, vector<16x32xf32> -> vector<16x32xf32>
      %c0_39 = arith.constant 0 : index
      %c32 = arith.constant 32 : index
      %92 = vector.load %arg22[%c0_39, %c32] : memref<16x128xf32, #tpu.memory_space<vmem>>, vector<16x32xf32>
      tpu.vector_store %arg22[%c0_39, %c32], %91 {strides = array<i32>} : memref<16x128xf32, #tpu.memory_space<vmem>>, vector<16x32xf32>,
      %93 = vector.extract_strided_slice %44 {offsets = [0, 64], sizes = [16, 32], strides = [1, 1]} : vector<16x128xbf16> to vector<16x32xbf16>
      %94 = vector.extract_strided_slice %53 {offsets = [64, 0], sizes = [32, 16], strides = [1, 1]} : vector<128x16xbf16> to vector<32x16xbf16>
      %cst_40 = arith.constant dense<0.000000e+00> : vector<16x16xf32>
      %95 = tpu.matmul %93, %94, %cst_40 {dimension_numbers = #tpu.dot_dimension_numbers<[1], [0], [0], [1], [0, 0, 1, 1], [], []>} : vector<16x32xbf16>, vector<32x16xbf16>, vector<16x16xf32> -> vector<16x16xf32>
      %96 = vector.broadcast %52 : vector<1x16xf32> to vector<16x16xf32>
      %97 = arith.addf %95, %96 : vector<16x16xf32>
      %cst_41 = arith.constant dense<0xFF800000> : vector<16xf32>
      %98 = vector.multi_reduction <maximumf>, %97, %cst_41 [1] : vector<16x16xf32> to vector<16xf32>
      %99 = vector.shape_cast %98 : vector<16xf32> to vector<16x1xf32>
      %100 = vector.broadcast %99 : vector<16x1xf32> to vector<16x16xf32>
      %101 = arith.subf %97, %100 : vector<16x16xf32>
      %102 = math.exp %101 : vector<16x16xf32>
      %cst_42 = arith.constant dense<0.000000e+00> : vector<16xf32>
      %103 = vector.multi_reduction <add>, %102, %cst_42 [1] : vector<16x16xf32> to vector<16xf32>
      %104 = vector.shape_cast %103 : vector<16xf32> to vector<16x1xf32>
      %105 = tpu.reciprocal %104 {approx = true} : vector<16x1xf32> -> vector<16x1xf32>
      %106 = vector.broadcast %105 : vector<16x1xf32> to vector<16x16xf32>
      %107 = arith.mulf %102, %106 : vector<16x16xf32>
      %108 = arith.truncf %107 : vector<16x16xf32> to vector<16x16xbf16>
      %109 = vector.extract_strided_slice %54 {offsets = [0, 64], sizes = [16, 32], strides = [1, 1]} : vector<16x128xbf16> to vector<16x32xbf16>
      %cst_43 = arith.constant dense<0.000000e+00> : vector<16x32xf32>
      %110 = tpu.matmul %108, %109, %cst_43 {dimension_numbers = #tpu.dot_dimension_numbers<[1], [0], [0], [1], [0, 0, 1, 1], [], []>} : vector<16x16xbf16>, vector<16x32xbf16>, vector<16x32xf32> -> vector<16x32xf32>
      %c0_44 = arith.constant 0 : index
      %c64 = arith.constant 64 : index
      %111 = vector.load %arg22[%c0_44, %c64] : memref<16x128xf32, #tpu.memory_space<vmem>>, vector<16x32xf32>
      tpu.vector_store %arg22[%c0_44, %c64], %110 {strides = array<i32>} : memref<16x128xf32, #tpu.memory_space<vmem>>, vector<16x32xf32>,
      %112 = vector.extract_strided_slice %44 {offsets = [0, 96], sizes = [16, 32], strides = [1, 1]} : vector<16x128xbf16> to vector<16x32xbf16>
      %113 = vector.extract_strided_slice %53 {offsets = [96, 0], sizes = [32, 16], strides = [1, 1]} : vector<128x16xbf16> to vector<32x16xbf16>
      %cst_45 = arith.constant dense<0.000000e+00> : vector<16x16xf32>
      %114 = tpu.matmul %112, %113, %cst_45 {dimension_numbers = #tpu.dot_dimension_numbers<[1], [0], [0], [1], [0, 0, 1, 1], [], []>} : vector<16x32xbf16>, vector<32x16xbf16>, vector<16x16xf32> -> vector<16x16xf32>
      %115 = vector.broadcast %52 : vector<1x16xf32> to vector<16x16xf32>
      %116 = arith.addf %114, %115 : vector<16x16xf32>
      %cst_46 = arith.constant dense<0xFF800000> : vector<16xf32>
      %117 = vector.multi_reduction <maximumf>, %116, %cst_46 [1] : vector<16x16xf32> to vector<16xf32>
      %118 = vector.shape_cast %117 : vector<16xf32> to vector<16x1xf32>
      %119 = vector.broadcast %118 : vector<16x1xf32> to vector<16x16xf32>
      %120 = arith.subf %116, %119 : vector<16x16xf32>
      %121 = math.exp %120 : vector<16x16xf32>
      %cst_47 = arith.constant dense<0.000000e+00> : vector<16xf32>
      %122 = vector.multi_reduction <add>, %121, %cst_47 [1] : vector<16x16xf32> to vector<16xf32>
      %123 = vector.shape_cast %122 : vector<16xf32> to vector<16x1xf32>
      %124 = tpu.reciprocal %123 {approx = true} : vector<16x1xf32> -> vector<16x1xf32>
      %125 = vector.broadcast %124 : vector<16x1xf32> to vector<16x16xf32>
      %126 = arith.mulf %121, %125 : vector<16x16xf32>
      %127 = arith.truncf %126 : vector<16x16xf32> to vector<16x16xbf16>
      %128 = vector.extract_strided_slice %54 {offsets = [0, 96], sizes = [16, 32], strides = [1, 1]} : vector<16x128xbf16> to vector<16x32xbf16>
      %cst_48 = arith.constant dense<0.000000e+00> : vector<16x32xf32>
      %129 = tpu.matmul %127, %128, %cst_48 {dimension_numbers = #tpu.dot_dimension_numbers<[1], [0], [0], [1], [0, 0, 1, 1], [], []>} : vector<16x16xbf16>, vector<16x32xbf16>, vector<16x32xf32> -> vector<16x32xf32>
      %c0_49 = arith.constant 0 : index
      %c96 = arith.constant 96 : index
      %130 = vector.load %arg22[%c0_49, %c96] : memref<16x128xf32, #tpu.memory_space<vmem>>, vector<16x32xf32>
      tpu.vector_store %arg22[%c0_49, %c96], %129 {strides = array<i32>} : memref<16x128xf32, #tpu.memory_space<vmem>>, vector<16x32xf32>,
      %c0_50 = arith.constant 0 : index
      %c0_51 = arith.constant 0 : index
      %131 = vector.load %arg22[%c0_50, %c0_51] : memref<16x128xf32, #tpu.memory_space<vmem>>, vector<16x128xf32>
      %132 = arith.truncf %131 : vector<16x128xf32> to vector<16x128xbf16>
      %c0_52 = arith.constant 0 : index
      %c0_53 = arith.constant 0 : index
      %133 = vector.load %arg14[%c0_52, %c0_53] : memref<128x128xbf16, #tpu.memory_space<vmem>>, vector<128x128xbf16>
      %cst_54 = arith.constant dense<0.000000e+00> : vector<16x128xf32>
      %134 = tpu.matmul %132, %133, %cst_54 {dimension_numbers = #tpu.dot_dimension_numbers<[1], [0], [0], [1], [0, 0, 1, 1], [], []>} : vector<16x128xbf16>, vector<128x128xbf16>, vector<16x128xf32> -> vector<16x128xf32>
      %c0_55 = arith.constant 0 : index
      %c0_56 = arith.constant 0 : index
      %135 = vector.load %arg18[%c0_55, %c0_56] : memref<1x128xf32, #tpu.memory_space<vmem>>, vector<1x128xf32>
      %136 = vector.broadcast %135 : vector<1x128xf32> to vector<16x128xf32>
      %137 = arith.addf %134, %136 : vector<16x128xf32>
      %138 = arith.addf %12, %137 : vector<16x128xf32>
      %139 = arith.truncf %138 : vector<16x128xf32> to vector<16x128xbf16>
      %c0_57 = arith.constant 0 : index
      %c0_58 = arith.constant 0 : index
      %c0_59 = arith.constant 0 : index
      %c0_60 = arith.constant 0 : index
      %140 = vector.load %arg19[%c0_57, %c0_58, %c0_59, %c0_60] : memref<1x1x16x128xbf16, #tpu.memory_space<vmem>>, vector<1x1x16x128xbf16>
      %141 = vector.shape_cast %140 : vector<1x1x16x128xbf16> to vector<16x128xbf16>
      %142 = vector.shape_cast %139 : vector<16x128xbf16> to vector<1x1x16x128xbf16>
      tpu.vector_store %arg19[%c0_57, %c0_58, %c0_59, %c0_60], %142 {strides = array<i32>} : memref<1x1x16x128xbf16, #tpu.memory_space<vmem>>, vector<1x1x16x128xbf16>,
    } else {
    }
    return
  }
  func.func @transform_0(%arg0: i32, %arg1: i32, %arg2: i32, %arg3: memref<1xi32, #tpu.memory_space<smem>>, %arg4: memref<1xi32, #tpu.memory_space<smem>>) -> (i32, i32, i32, i32) {
    %c0_i32 = arith.constant 0 : i32
    %c0_i32_0 = arith.constant 0 : i32
    return %arg0, %arg1, %arg2, %c0_i32 : i32, i32, i32, i32
  }
  func.func @transform_1(%arg0: i32, %arg1: i32, %arg2: i32, %arg3: memref<1xi32, #tpu.memory_space<smem>>, %arg4: memref<1xi32, #tpu.memory_space<smem>>) -> (i32, i32, i32, i32) {
    %c0_i32 = arith.constant 0 : i32
    %c0_i32_0 = arith.constant 0 : i32
    %c0_i32_1 = arith.constant 0 : i32
    return %arg0, %arg1, %c0_i32, %c0_i32_0 : i32, i32, i32, i32
  }
  func.func @transform_2(%arg0: i32, %arg1: i32, %arg2: i32, %arg3: memref<1xi32, #tpu.memory_space<smem>>, %arg4: memref<1xi32, #tpu.memory_space<smem>>) -> (i32, i32, i32, i32) {
    %c0_i32 = arith.constant 0 : i32
    %c0_i32_0 = arith.constant 0 : i32
    return %arg0, %arg1, %arg2, %c0_i32 : i32, i32, i32, i32
  }
  func.func @transform_3(%arg0: i32, %arg1: i32, %arg2: i32, %arg3: memref<1xi32, #tpu.memory_space<smem>>, %arg4: memref<1xi32, #tpu.memory_space<smem>>) -> (i32, i32, i32, i32) {
    %c0_i32 = arith.constant 0 : i32
    %c0_i32_0 = arith.constant 0 : i32
    %c0_i32_1 = arith.constant 0 : i32
    return %arg0, %arg1, %c0_i32, %c0_i32_0 : i32, i32, i32, i32
  }
  func.func @transform_4(%arg0: i32, %arg1: i32, %arg2: i32, %arg3: memref<1xi32, #tpu.memory_space<smem>>, %arg4: memref<1xi32, #tpu.memory_space<smem>>) -> (i32, i32) {
    %c0_i32 = arith.constant 0 : i32
    %c0_i32_0 = arith.constant 0 : i32
    %c0_i32_1 = arith.constant 0 : i32
    return %c0_i32, %c0_i32_0 : i32, i32
  }
  func.func @transform_5(%arg0: i32, %arg1: i32, %arg2: i32, %arg3: memref<1xi32, #tpu.memory_space<smem>>, %arg4: memref<1xi32, #tpu.memory_space<smem>>) -> (i32, i32) {
    %c0_i32 = arith.constant 0 : i32
    %c0_i32_0 = arith.constant 0 : i32
    %c0_i32_1 = arith.constant 0 : i32
    return %c0_i32, %c0_i32_0 : i32, i32
  }
  func.func @transform_6(%arg0: i32, %arg1: i32, %arg2: i32, %arg3: memref<1xi32, #tpu.memory_space<smem>>, %arg4: memref<1xi32, #tpu.memory_space<smem>>) -> (i32, i32) {
    %c0_i32 = arith.constant 0 : i32
    %c0_i32_0 = arith.constant 0 : i32
    %c0_i32_1 = arith.constant 0 : i32
    return %c0_i32, %c0_i32_0 : i32, i32
  }
  func.func @transform_7(%arg0: i32, %arg1: i32, %arg2: i32, %arg3: memref<1xi32, #tpu.memory_space<smem>>, %arg4: memref<1xi32, #tpu.memory_space<smem>>) -> (i32, i32) {
    %c0_i32 = arith.constant 0 : i32
    %c0_i32_0 = arith.constant 0 : i32
    %c0_i32_1 = arith.constant 0 : i32
    return %c0_i32, %c0_i32_0 : i32, i32
  }
  func.func @transform_8(%arg0: i32, %arg1: i32, %arg2: i32, %arg3: memref<1xi32, #tpu.memory_space<smem>>, %arg4: memref<1xi32, #tpu.memory_space<smem>>) -> (i32, i32) {
    %c0_i32 = arith.constant 0 : i32
    %c0_i32_0 = arith.constant 0 : i32
    %c0_i32_1 = arith.constant 0 : i32
    return %c0_i32, %c0_i32_0 : i32, i32
  }
  func.func @transform_9(%arg0: i32, %arg1: i32, %arg2: i32, %arg3: memref<1xi32, #tpu.memory_space<smem>>, %arg4: memref<1xi32, #tpu.memory_space<smem>>) -> (i32, i32) {
    %c0_i32 = arith.constant 0 : i32
    %c0_i32_0 = arith.constant 0 : i32
    %c0_i32_1 = arith.constant 0 : i32
    return %c0_i32, %c0_i32_0 : i32, i32
  }
  func.func @transform_10(%arg0: i32, %arg1: i32, %arg2: i32, %arg3: memref<1xi32, #tpu.memory_space<smem>>, %arg4: memref<1xi32, #tpu.memory_space<smem>>) -> (i32, i32) {
    %c0_i32 = arith.constant 0 : i32
    %c0_i32_0 = arith.constant 0 : i32
    %c0_i32_1 = arith.constant 0 : i32
    return %c0_i32, %c0_i32_0 : i32, i32
  }
  func.func @transform_11(%arg0: i32, %arg1: i32, %arg2: i32, %arg3: memref<1xi32, #tpu.memory_space<smem>>, %arg4: memref<1xi32, #tpu.memory_space<smem>>) -> (i32, i32) {
    %c0_i32 = arith.constant 0 : i32
    %c0_i32_0 = arith.constant 0 : i32
    %c0_i32_1 = arith.constant 0 : i32
    return %c0_i32, %c0_i32_0 : i32, i32
  }
  func.func @transform_12(%arg0: i32, %arg1: i32, %arg2: i32, %arg3: memref<1xi32, #tpu.memory_space<smem>>, %arg4: memref<1xi32, #tpu.memory_space<smem>>) -> (i32, i32) {
    %c0_i32 = arith.constant 0 : i32
    %c0_i32_0 = arith.constant 0 : i32
    %c0_i32_1 = arith.constant 0 : i32
    return %c0_i32, %c0_i32_0 : i32, i32
  }
  func.func @transform_13(%arg0: i32, %arg1: i32, %arg2: i32, %arg3: memref<1xi32, #tpu.memory_space<smem>>, %arg4: memref<1xi32, #tpu.memory_space<smem>>) -> (i32, i32) {
    %c0_i32 = arith.constant 0 : i32
    %c0_i32_0 = arith.constant 0 : i32
    %c0_i32_1 = arith.constant 0 : i32
    return %c0_i32, %c0_i32_0 : i32, i32
  }
  func.func @transform_14(%arg0: i32, %arg1: i32, %arg2: i32, %arg3: memref<1xi32, #tpu.memory_space<smem>>, %arg4: memref<1xi32, #tpu.memory_space<smem>>) -> (i32, i32, i32, i32) {
    %c0_i32 = arith.constant 0 : i32
    %c0_i32_0 = arith.constant 0 : i32
    return %arg0, %arg1, %arg2, %c0_i32 : i32, i32, i32, i32
  }
}

</mosaic_0001>

<bundles_post_ra>
// kernel: tpu_custom_call.1
= control target key start
LH: loop header
LB: loop body
LE: loop exit
PB: predicated region body
PF: predicated region fallthrough
CT: control target
= control target key end

     0   :  { %s3698_s0 = inlined_call_operand.<no memory space> [shape: s32[1], index: 0, kind: input, shape index: {}]   ;;  %s3699_s1 = inlined_call_operand.<no memory space> [shape: s32[1], index: 1, kind: input, shape index: {}]   ;;  %s3700_s2 = inlined_call_operand.hbm [shape: f32[1,2,16,128], index: 2, kind: input, shape index: {}]   ;;  %s3701_s3 = inlined_call_operand.hbm [shape: f32[1,2,16,128], index: 3, kind: input, shape index: {}]   ;;  %s3702_s4 = inlined_call_operand.hbm [shape: f32[1,2,16,128], index: 4, kind: input, shape index: {}]   ;;  %s3703_s5 = inlined_call_operand.hbm [shape: f32[1,2,16,128], index: 5, kind: input, shape index: {}]   ;;  %s3704_s6 = inlined_call_operand.vmem [shape: f32[1,128], index: 6, kind: input, shape index: {}]   ;;  %s3705_s7 = inlined_call_operand.vmem [shape: f32[1,128], index: 7, kind: input, shape index: {}]   ;;  %s3706_s8 = inlined_call_operand.hbm [shape: bf16[128,128], index: 8, kind: input, shape index: {}]   ;;  %s3707_s9 = inlined_call_operand.hbm [shape: bf16[128,128], index: 9, kind: input, shape index: {}]   ;;  %s3708_s10 = inlined_call_operand.hbm [shape: bf16[128,128], index: 10, kind: input, shape index: {}]   ;;  %s3709_s11 = inlined_call_operand.hbm [shape: bf16[128,128], index: 11, kind: input, shape index: {}]   ;;  %s3710_s12 = inlined_call_operand.vmem [shape: f32[1,128], index: 12, kind: input, shape index: {}]   ;;  %s3711_s13 = inlined_call_operand.vmem [shape: f32[1,128], index: 13, kind: input, shape index: {}]   ;;  %s3712_s14 = inlined_call_operand.vmem [shape: f32[1,128], index: 14, kind: input, shape index: {}]   ;;  %s3713_s15 = inlined_call_operand.vmem [shape: f32[1,128], index: 15, kind: input, shape index: {}]   ;;  %s3714_s16 = inlined_call_operand.hbm [shape: bf16[1,2,16,128], index: 16, kind: output, shape index: {}]  }
   0x1   :  { %3736 = sst [smem:[#allocation37_spill]] %s3698_s0 }
   0x2   :  { %3737 = sst [smem:[#allocation38_spill]] %s3700_s2 }
   0x3   :  { %3738 = sst [smem:[#allocation39_spill]] %s3701_s3 }
   0x4   :  { %3739 = sst [smem:[#allocation40_spill]] %s3706_s8 }
   0x5   :  { %3740 = sst [smem:[#allocation41_spill]] %s3707_s9 }
   0x6   :  { %3741 = sst [smem:[#allocation42_spill]] %s3708_s10 }
   0x7   :  { %3742 = sst [smem:[#allocation43_spill]] %s3710_s12 }
   0x8   :  { %3743 = sst [smem:[#allocation44_spill]] %s3712_s14 }
   0x9   :  { %3744 = sst [smem:[#allocation45_spill]] %s3713_s15 }
   0xa   :  { %3745 = sst [smem:[#allocation46_spill]] %s3714_s16 }
   0xb   :  { %s3746_s23 = sld [smem:[#allocation37_spill]] }
   0xc   :  { %22 = sst [smem:[#allocation7]] %s3699_s1 }
  0x11   :  { %21 = sst [smem:[#allocation6]] %s3746_s23 }
  0x12   :  { %23 = vsyncpa [#allocation9], 0 }
  0x13   :  { %25 = vsyncpa [#allocation9 + $0x1], 0 }
  0x14   :  { %26 = vsyncpa [#allocation12], 0 }
  0x15   :  { %28 = vsyncpa [#allocation12 + $0x1], 0 }
  0x16   :  { %29 = vsyncpa [#allocation15], 0 }
  0x17   :  { %31 = vsyncpa [#allocation15 + $0x1], 0 }
  0x18   :  { %32 = vsyncpa [#allocation18], 0 }
  0x19   :  { %33 = vsyncpa [#allocation21], 0 }
  0x1a   :  { %34 = vsyncpa [#allocation10], 0 }
  0x1b   :  { %36 = vsyncpa [#allocation10 + $0x1], 0  ;;  %s3194_s26 = smov 0   ;;  %s3196_s27 = smov 0  }
  0x1c   :  { %s3198_s28 = smov 0   ;;  %s3200_s29 = smov 0  }
  0x1d   :  { %s3202_s30 = smov 0   ;;  %s3204_s1 = smov 0  }
  0x1e LB: > { %3747 = sst [smem:[#allocation30_spill]] %s3060_s26  ;;  %s3225_s0 = sadd.s32 4294967295, %s3080_s1   ;;  %s3080_s1 = sphi %s3204_s1, %s42_s1   ;;  %s3076_s30 = sphi %s3202_s30, %s3795_s30   ;;  %s3072_s29 = sphi %s3200_s29, %s3794_s29   ;;  %s3068_s28 = sphi %s3198_s28, %s3798_s28   ;;  %s3064_s27 = sphi %s3196_s27, %s3797_s27   ;;  %s3060_s26 = sphi %s3194_s26, %s3796_s26  }
  0x1f   : > { %3748 = sst [smem:[#allocation31_spill]] %s3072_s29  ;;  %s2213_s17 = sadd.s32 4294967294, %s3080_s1  }
  0x20   : > { %3749 = sst [smem:[#allocation32_spill]] %s3076_s30  ;;  %p85_p0 = scmp.ne.s32.totalorder %s3064_s27, %s3060_s26 }
  0x21   : > { %p3718_p1 = scmp.eq.s32.totalorder %s3225_s0, 0  ;;  %p409_p2 = scmp.eq.s32.totalorder %s3225_s0, 1 }
  0x22   : > { %p415_p3 = scmp.eq.s32.totalorder %s2213_s17, 1  ;;  %p2214_p5 = scmp.ge.s32.totalorder %s3080_s1, 1 }
  0x23   : > { %p3234_p4 = por %p3718_p1, %p85_p0  ;;  %p422_p7 = scmp.lt.s32.totalorder %s3080_s1, 3 }
  0x24   : > { %p3239_p6 = por %p415_p3, %p85_p0  ;;  %s3082_s21 = smov [#allocation16]  }
  0x25   : > { %p3244_p8 = pnand %p2214_p5, %p422_p7  ;;  %s440_s22 = sshll.u32 %s3082_s21, 4  ;;  %s441_s22 = int_to_ptr.vmem [resolvable:$true] %s440_s22 }
  0x26   : > { %s3751_s19 = scalar_select %p3239_p6, 1, 0 }
  0x27   : > { %p2577_p9 = pneg %p3244_p8  ;;  %s3083_s24 = smov [#allocation17]  }
  0x28   : > { %3752 = sst [smem:[#allocation33_spill]] %s3751_s19  ;;  %s453_s25 = sshll.u32 %s3083_s24, 4  ;;  %s454_s25 = int_to_ptr.vmem [resolvable:$true] %s453_s25 }
  0x29   : > { %p3253_p11 = pnand %p2577_p9, %p3718_p1  ;;  %s2775_s17 = scalar_lea.vmem %s441_s22, 1024 }
  0x2a   : > { %p2776_p13 = scmp.ne.s32.totalorder %s441_s22, %s2775_s17  ;;  %p2783_p5 = scmp.lt.s32.totalorder %s441_s22, %s441_s22 }
  0x2b   : > { %p3728_p12 = pneg %p3253_p11  ;;  %p2784_p7 = scmp.lt.s32.totalorder %s2775_s17, %s2775_s17 }
  0x2d   : > { %p2778_p0 = pnand %p2776_p13, %p3728_p12  ;;  %p2785_p10 = por %p2784_p7, %p2783_p5 }
  0x2f   : > { %p2779_p3 = pneg %p2778_p0 }
  0x31   : > { %p2786_p9 = pnand %p2785_p10, %p2779_p3 }
  0x33   : > { %2789 = shalt.err (!%p2786_p9)
}
  0x34   : > { %s3719_s21 = smov 64   ;;  %s3721_s19 = smov 4  }
  0x35   : > { %s3755_s8 = sld [smem:[#allocation40_spill]]  ;;  %s2801_s16 = scalar_lea.vmem %s454_s25, 1024 }
  0x36   : > { %p2802_p13 = scmp.ne.s32.totalorder %s454_s25, %s2801_s16  ;;  %p2809_p10 = scmp.lt.s32.totalorder %s454_s25, %s454_s25 }
  0x37   : > { %p2810_p3 = scmp.lt.s32.totalorder %s2801_s16, %s2801_s16 }
  0x38   : > { %p2804_p0 = pnand %p2802_p13, %p3728_p12 }
  0x39   : > { %p2811_p7 = por %p2810_p3, %p2809_p10 }
  0x3a   : > { %p2805_p5 = pneg %p2804_p0 }
  0x3b   : > { %2580 = dma.hbm_to_vmem [thread:$0]  (!%p3253_p11), %s3755_s8, 1024, %s441_s22, [#allocation15], %s3719_s21, %s3719_s21, %s3721_s19  }
  0x3c   : > { %p2812_p9 = pnand %p2811_p7, %p2805_p5 }
  0x3e   : > { %2815 = shalt.err (!%p2812_p9)
}
  0x3f   : > { %s3756_s9 = sld [smem:[#allocation41_spill]]  ;;  %s57_s16 = sadd.s32 1, %s3076_s30 }
  0x40   : > { %s72_s26 = sadd.s32 1, %s3068_s28  ;;  %p59_p13 = scmp.ge.s32.totalorder %s57_s16, 2 }
  0x41   : > { %p79_p0 = scmp.ne.s32.totalorder %s3068_s28, %s3064_s27  ;;  %p80_p5 = scmp.eq.s32.totalorder %s3080_s1, 0 }
  0x42   : > { %p2611_p10 = scmp.lt.s32.totalorder %s3080_s1, 2  ;;  %s3800_s16 = smov (%p59_p13, %s57_s16), 0 }
  0x43   : > { %3757 = sst [smem:[#allocation34_spill]] %s3800_s16  ;;  %p81_p3 = por %p80_p5, %p79_p0 }
  0x44   : > { %p3291_p7 = por %p409_p2, %p79_p0  ;;  %s66_s22 = ssub.s32 %s3076_s30, %s3800_s16 }
  0x45   : > { %2583 = dma.hbm_to_vmem [thread:$0]  (!%p3253_p11), %s3756_s9, 1024, %s454_s25, [#allocation18], %s3719_s21, %s3719_s21, %s3721_s19  }
  0x46   : > { %s3758_s29 = scalar_select %p3291_p7, 1, 0 }
  0x47   : > { %s3726_s25 = sand.u32 1, %s3068_s28   ;;  %p70_p9 = scmp.eq.s32.totalorder %s66_s22, 0 }
  0x48   : > { %3759 = sst [smem:[#allocation35_spill]] %s3758_s29  ;;  %s3300_s24 = sshll.u32 %s3726_s25, 4 }
  0x49   : > { %s3303_s17 = sshll.u32 %s3076_s30, 8  ;;  %p3305_p1 = pnand %p2611_p10, %p81_p3 }
  0x4a   : > { %s3310_s19 = scalar_select %p70_p9, %s3068_s28, %s72_s26  }
  0x4b   : > { %s3729_s8 = sand.u32 1, %s3080_s1   ;;  %s3762_s3 = sld [smem:[#allocation39_spill]] }
  0x4c   : > { %3761 = sst [smem:[#allocation36_spill]] %s3310_s19  ;;  %s534_s29 = scalar_lea.vmem [#allocation11], %s3300_s24 }
  0x4d   : > { %s543_s25 = sshll.u32 %s534_s29, 4  ;;  %s3320_s30 = scalar_lea.sflag [#allocation12], %s3729_s8  ;;  %s544_s25 = int_to_ptr.vmem [resolvable:$true] %s543_s25 }
  0x4e   : > { %p3730_p2 = pneg %p3305_p1  ;;  %s2829_s15 = scalar_lea.vmem %s544_s25, 256 }
  0x4f   : > { %p2830_p13 = scmp.ne.s32.totalorder %s544_s25, %s2829_s15  ;;  %s3086_s26 = smov [#allocation11]  }
  0x50   : > { %s2834_s19 = sshll.u32 %s3086_s26, 4  ;;  %s2835_s19 = int_to_ptr.vmem [resolvable:$false] %s2834_s19 }
  0x51   : > { %s542_s22 = scalar_lea.hbm %s3762_s3, %s3303_s17  ;;  %p2832_p0 = pnand %p2830_p13, %p3730_p2 }
  0x52   : > { %s2836_s12 = scalar_lea.vmem %s2835_s19, 512  ;;  %p2837_p10 = scmp.lt.s32.totalorder %s544_s25, %s2835_s19 }
  0x53   : > { %p2833_p5 = pneg %p2832_p0  ;;  %p2838_p3 = scmp.lt.s32.totalorder %s2836_s12, %s2829_s15 }
  0x55   : > { %p2839_p9 = por %p2838_p3, %p2837_p10 }
  0x57   : > { %p2840_p12 = pnand %p2839_p9, %p2833_p5 }
  0x59   : > { %2843 = shalt.err (!%p2840_p12)
}
  0x5a   : > { %s3732_s9 = smov 128   ;;  %s3734_s16 = smov 8  }
  0x5b   : > { %2596 = dma.hbm_to_vmem [thread:$0]  (!%p3305_p1), %s542_s22, 256, %s544_s25, %s3320_s30, %s3732_s9, %s3732_s9, %s3734_s16  }
  0x5c   : > { %s3089_s29 = smov [#allocation19]   ;;  %s3090_s26 = smov [#allocation20]  }
  0x5d   : > { %s466_s8 = sshll.u32 %s3089_s29, 4  ;;  %s479_s3 = sshll.u32 %s3090_s26, 4  ;;  %s467_s8 = int_to_ptr.vmem [resolvable:$true] %s466_s8  ;;  %s480_s3 = int_to_ptr.vmem [resolvable:$true] %s479_s3 }
  0x5e   : > { %s2855_s12 = scalar_lea.vmem %s467_s8, 1024  ;;  %p3763_p12 = pneg %p3253_p11 }
  0x5f   : > { %p2856_p13 = scmp.ne.s32.totalorder %s467_s8, %s2855_s12  ;;  %p2863_p10 = scmp.lt.s32.totalorder %s467_s8, %s467_s8 }
  0x60   : > { %p2864_p3 = scmp.lt.s32.totalorder %s2855_s12, %s2855_s12 }
  0x61   : > { %p2858_p0 = pnand %p2856_p13, %p3763_p12 }
  0x62   : > { %p2865_p9 = por %p2864_p3, %p2863_p10 }
  0x63   : > { %p2859_p5 = pneg %p2858_p0 }
  0x65   : > { %p2866_p2 = pnand %p2865_p9, %p2859_p5 }
  0x67   : > { %2869 = shalt.err (!%p2866_p2)
}
  0x68   : > { %s3764_s15 = smov 4   ;;  %s3765_s19 = smov 64  }
  0x69   : > { %s3766_s10 = sld [smem:[#allocation42_spill]]  ;;  %s2881_s29 = scalar_lea.vmem %s480_s3, 1024 }
  0x6a   : > { %p2882_p6 = scmp.ne.s32.totalorder %s480_s3, %s2881_s29  ;;  %p3767_p13 = pmov %p3763_p12 }
  0x6b   : > { %p2889_p7 = scmp.lt.s32.totalorder %s480_s3, %s480_s3  ;;  %p2890_p10 = scmp.lt.s32.totalorder %s2881_s29, %s2881_s29 }
  0x6c   : > { %p2884_p12 = pnand %p2882_p6, %p3767_p13 }
  0x6d   : > { %p2891_p5 = por %p2890_p10, %p2889_p7 }
  0x6e   : > { %p2885_p0 = pneg %p2884_p12 }
  0x6f   : > { %2586 = dma.hbm_to_vmem [thread:$0]  (!%p3253_p11), %s3766_s10, 1024, %s467_s8, [#allocation18], %s3765_s19, %s3765_s19, %s3764_s15  }
  0x70   : > { %p2892_p2 = pnand %p2891_p5, %p2885_p0 }
  0x72   : > { %2895 = shalt.err (!%p2892_p2)
}
  0x73   : > { %2589 = dma.hbm_to_vmem [thread:$0]  (!%p3253_p11), %s3709_s11, 1024, %s480_s3, [#allocation21], %s3765_s19, %s3765_s19, %s3764_s15  }
  0x74   : > { %s3768_s2 = sld [smem:[#allocation38_spill]]  ;;  %s509_s29 = scalar_lea.vmem [#allocation8], %s3300_s24 }
  0x75   : > { %s520_s9 = sshll.u32 %s509_s29, 4  ;;  %s3769_s16 = sand.u32 1, %s3068_s28   ;;  %s521_s9 = int_to_ptr.vmem [resolvable:$true] %s520_s9 }
  0x76   : > { %s506_s23 = scalar_lea.sflag [#allocation9], %s3769_s16  ;;  %s2909_s10 = scalar_lea.vmem %s521_s9, 256 }
  0x77   : > { %p2910_p6 = scmp.ne.s32.totalorder %s521_s9, %s2909_s10  ;;  %p3770_p7 = pneg %p3305_p1 }
  0x78   : > { %s3091_s26 = smov [#allocation8]  }
  0x79   : > { %p2912_p3 = pnand %p2910_p6, %p3770_p7  ;;  %s2914_s12 = sshll.u32 %s3091_s26, 4  ;;  %s2915_s12 = int_to_ptr.vmem [resolvable:$false] %s2914_s12 }
  0x7a   : > { %s519_s22 = scalar_lea.hbm %s3768_s2, %s3303_s17  ;;  %s2916_s14 = scalar_lea.vmem %s2915_s12, 512 }
  0x7b   : > { %p2913_p9 = pneg %p2912_p3  ;;  %p2917_p11 = scmp.lt.s32.totalorder %s521_s9, %s2915_s12 }
  0x7c   : > { %p2918_p13 = scmp.lt.s32.totalorder %s2916_s14, %s2909_s10 }
  0x7e   : > { %p2919_p12 = por %p2918_p13, %p2917_p11 }
  0x80   : > { %p2920_p0 = pnand %p2919_p12, %p2913_p9 }
  0x82   : > { %2923 = shalt.err (!%p2920_p0)
}
  0x83   : > { %s3771_s3 = smov 8   ;;  %s3772_s15 = smov 128  }
  0x84   : > { %2593 = dma.hbm_to_vmem [thread:$0]  (!%p3305_p1), %s519_s22, 256, %s521_s9, %s506_s23, %s3772_s15, %s3772_s15, %s3771_s3  }
  0x85   : > { %s567_s8 = scalar_lea.hbm %s3702_s4, %s3303_s17  ;;  %s557_s25 = scalar_lea.vmem [#allocation13], %s3300_s24 }
  0x86   : > { %s568_s29 = sshll.u32 %s557_s25, 4  ;;  %p3773_p5 = pmov %p3770_p7  ;;  %s569_s29 = int_to_ptr.vmem [resolvable:$true] %s568_s29 }
  0x87   : > { %s2937_s10 = scalar_lea.vmem %s569_s29, 256  ;;  %s3092_s14 = smov [#allocation13]  }
  0x88   : > { %p2938_p10 = scmp.ne.s32.totalorder %s569_s29, %s2937_s10  ;;  %s2942_s26 = sshll.u32 %s3092_s14, 4  ;;  %s2943_s26 = int_to_ptr.vmem [resolvable:$false] %s2942_s26 }
  0x89   : > { %s2944_s12 = scalar_lea.vmem %s2943_s26, 512  ;;  %p2945_p7 = scmp.lt.s32.totalorder %s569_s29, %s2943_s26 }
  0x8a   : > { %p2940_p2 = pnand %p2938_p10, %p3773_p5  ;;  %p2946_p3 = scmp.lt.s32.totalorder %s2944_s12, %s2937_s10 }
  0x8c   : > { %p2941_p6 = pneg %p2940_p2  ;;  %p2947_p9 = por %p2946_p3, %p2945_p7 }
  0x8e   : > { %p2948_p11 = pnand %p2947_p9, %p2941_p6 }
  0x90   : > { %2951 = shalt.err (!%p2948_p11)
}
  0x91   : > { %2599 = dma.hbm_to_vmem [thread:$0]  (!%p3305_p1), %s567_s8, 256, %s569_s29, %s3320_s30, %s3772_s15, %s3772_s15, %s3771_s3  }
  0x92   : > { %s590_s23 = scalar_lea.hbm %s3703_s5, %s3303_s17  ;;  %s582_s16 = scalar_lea.vmem [#allocation14], %s3300_s24 }
  0x93   : > { %s591_s19 = sshll.u32 %s582_s16, 4  ;;  %s3774_s25 = sand.u32 1, %s3080_s1   ;;  %s592_s19 = int_to_ptr.vmem [resolvable:$true] %s591_s19 }
  0x94   : > { %s579_s10 = scalar_lea.sflag [#allocation15], %s3774_s25  ;;  %s2965_s14 = scalar_lea.vmem %s592_s19, 256 }
  0x95   : > { %p2966_p13 = scmp.ne.s32.totalorder %s592_s19, %s2965_s14  ;;  %p3775_p12 = pmov %p3773_p5 }
  0x96   : > { %s3093_s26 = smov [#allocation14]  }
  0x97   : > { %p2968_p0 = pnand %p2966_p13, %p3775_p12  ;;  %s2970_s12 = sshll.u32 %s3093_s26, 4  ;;  %s2971_s12 = int_to_ptr.vmem [resolvable:$false] %s2970_s12 }
  0x98   : > { %s2972_s2 = scalar_lea.vmem %s2971_s12, 512  ;;  %p2973_p5 = scmp.lt.s32.totalorder %s592_s19, %s2971_s12 }
  0x99   : > { %p2969_p10 = pneg %p2968_p0  ;;  %p2974_p2 = scmp.lt.s32.totalorder %s2972_s2, %s2965_s14 }
  0x9b   : > { %p2975_p6 = por %p2974_p2, %p2973_p5 }
  0x9d   : > { %p2976_p7 = pnand %p2975_p6, %p2969_p10 }
  0x9f   : > { %2979 = shalt.err (!%p2976_p7)
}
  0xa0   : > { %2602 = dma.hbm_to_vmem [thread:$0]  (!%p3305_p1), %s590_s23, 256, %s592_s19, %s579_s10, %s3772_s15, %s3772_s15, %s3771_s3  }
  0xa1   : > { %603 = sbr.rel (%p3244_p8) target bundleno = 3489 (0xda1), region = 76  ;;  %s3402_s30 = sand.u32 (!%p3244_p8), 1, %s3064_s27  }
  0xa2   : > { %s3405_s24 = sshll.u32 (!%p3244_p8), %s3402_s30, 4  ;;  %s606_s2 = scalar_lea.sflag (!%p3244_p8), [#allocation9], %s3402_s30 }
  0xa3   : > { %s3409_s17 = scalar_lea.vmem (!%p3244_p8), [#allocation8], %s3405_s24 }
  0xa6   : > { %3031 = dma.done.wait (%p3234_p4), %s606_s2, 256  }
  0xa7   : > { %3033 = vsyncadd (%p3234_p4), %s606_s2, 4294967040  ;;  %s614_s20 = sand.u32 1, %s3225_s0   ;;  %s618_s3 = scalar_lea.vmem [#allocation11], %s3405_s24 }
  0xa8   : > { %s615_s21 = scalar_lea.sflag [#allocation12], %s614_s20 }
  0xa9   : > { %3035 = dma.done.wait (%p3234_p4), %s615_s21, 512  }
  0xaa   : > { %3037 = vsyncadd (%p3234_p4), %s615_s21, 4294966784  ;;  %s627_s15 = scalar_lea.vmem [#allocation13], %s3405_s24  ;;  %s633_s8 = scalar_lea.sflag [#allocation15], %s614_s20 }
  0xab   : > { %s636_s29 = scalar_lea.vmem [#allocation14], %s3405_s24 }
  0xac   : > { %3039 = dma.done.wait (%p3234_p4), %s633_s8, 256  }
  0xad   : > { %3041 = vsyncadd (%p3234_p4), %s633_s8, 4294967040  ;;  %p3776_p1 = scmp.eq.s32.totalorder %s3225_s0, 0 }
  0xaf   : > { %3043 = dma.done.wait (%p3776_p1), [#allocation15], 1024   ;;  %p3777_p8 = pmov %p3776_p1 }
  0xb0   : > { %p3778_p3 = pmov %p3776_p1 }
  0xb1   : > { %3045 = vsyncadd (%p3777_p8), [#allocation15], 4294966272 }
  0xb2   : > { %3047 = dma.done.wait (%p3778_p3), [#allocation18], 2048   ;;  %p3779_p9 = pmov %p3776_p1 }
  0xb3   : > { %p3780_p11 = pmov %p3776_p1 }
  0xb4   : > { %3049 = vsyncadd (%p3779_p9), [#allocation18], 4294965248 }
  0xb5   : > { %3051 = dma.done.wait (%p3780_p11), [#allocation21], 1024   ;;  %p3781_p13 = pmov %p3776_p1 }
  0xb6   : > { %s2241_s18 = sshll.u32 %s3402_s30, 3  ;;  %s717_s9 = sld [smem:[#allocation7]] }
  0xb7   : > { %3053 = vsyncadd (%p3781_p13), [#allocation21], 4294966272  ;;  %s3440_s22 = scalar_lea.vmem [#allocation22], %s2241_s18 }
  0xbc   : > { %p2243_p4 = scmp.le.s32.totalorder %s717_s9, 0 }
  0xbd   : > { %s3782_s12 = sld [smem:[#allocation44_spill]] (!%p2243_p4)  ;;  %s3099_s8 = smov (!%p2243_p4), 64  }
  0xbe   : > { %721 = sbr.rel (%p2243_p4) target bundleno = 3461 (0xd85), region = 112  ;;  %s3783_s20 = sld [smem:[#allocation43_spill]] (!%p2243_p4) }
  0xbf   : > { %s1283_s21 = sld [smem:[#allocation6]] (!%p2243_p4) }
  0xc0   : > { %s3784_s9 = sld [smem:[#allocation45_spill]] (!%p2243_p4) }
  0xc3   : > { %v728_v0 = vld [vmem:[%s618_s3] sm:$0xff]  ;;  %v729_v2 = vld [vmem:[%s618_s3 + $0x8] sm:$0xff]  ;;  %v3094_v5 = vmov 0.0   ;;  %vm3095_vm0 = vmmov 0   ;;  %vm1095_vm1 = vcmask 125952   ;;  %vm1319_vm2 = vcmask 261120  }
  0xc4   : > { %v1122_v1 = vld [vmem:[%s3409_s17] sm:$0xff]  ;;  %730 = vadd.xlane.f32.xlu0 %v728_v0  ;;  %v1123_v3 = vld [vmem:[%s3409_s17 + $0x8] sm:$0xff]  ;;  %2435 = vmatprep.subr.bf16.mxu1 %v3094_v5  ;;  %vm1364_vm4 = vcmask 130048   ;;  %s3097_s3 = smov 96   ;;  %vm1577_vm5 = vcmask 523520   ;;  %vm1716_vm6 = vcmask 785920  }
  0xc5   : > { %1124 = vadd.xlane.f32.xlu1 %v1122_v1  ;;  %v2681_v4 = vld [vmem:[#allocation19 + $0x38] sm:$0xff]   ;;  %2415 = vmatprep.subr.bf16.mxu0 %v3094_v5  ;;  %v2683_v23 = vld [vmem:[#allocation19 + $0x30] sm:$0xff]   ;;  %v2685_v25 = vld [vmem:[#allocation19 + $0x28] sm:$0xff]   ;;  %vm1855_vm7 = vcmask 1048320  }
  0xc6   : > { %2436 = vmatpush3.bf16.msra.mxu1 %v2681_v4  ;;  %v2682_v22 = vld [vmem:[#allocation17 + $0x38] sm:$0xff]   ;;  %v2684_v24 = vld [vmem:[#allocation17 + $0x30] sm:$0xff]   ;;  %v2686_v26 = vld [vmem:[#allocation17 + $0x28] sm:$0xff]   ;;  %2451 = vmatprep.mubr.msk.bf16.mxu1 %vm3095_vm0, %v3094_v5 }
  0xc7   : > { %2437 = vmatprep.subr.bf16.mxu1 %v3094_v5  ;;  %2416 = vmatpush3.bf16.msra.mxu0 %v2682_v22  ;;  %v2687_v27 = vld [vmem:[#allocation19 + $0x20] sm:$0xff]   ;;  %v2689_v29 = vld [vmem:[#allocation19 + $0x18] sm:$0xff]   ;;  %v2691_v31 = vld [vmem:[#allocation19 + $0x10] sm:$0xff]  }
  0xc8   : > { %732 = vadd.xlane.f32.xlu0 %v729_v2  ;;  %2417 = vmatprep.subr.bf16.mxu0 %v3094_v5  ;;  %v2688_v28 = vld [vmem:[#allocation17 + $0x20] sm:$0xff]   ;;  %v2690_v30 = vld [vmem:[#allocation17 + $0x18] sm:$0xff]   ;;  %v2692_v32 = vld [vmem:[#allocation17 + $0x10] sm:$0xff]  }
  0xc9   : > { %1126 = vadd.xlane.f32.xlu1 %v1123_v3  ;;  %2431 = vmatprep.mubr.msk.bf16.mxu0 %vm3095_vm0, %v3094_v5  ;;  %v2693_v33 = vld [vmem:[#allocation19 + $0x8] sm:$0xff]   ;;  %v2695_v35 = vld [vmem:[#allocation19] sm:$0xff]  }
  0xca   : > { %2438 = vmatpush3.bf16.msra.mxu1 %v2683_v23  ;;  %v2694_v34 = vld [vmem:[#allocation17 + $0x8] sm:$0xff]   ;;  %v2696_v36 = vld [vmem:[#allocation17] sm:$0xff]  }
  0xcb   : > { %2439 = vmatprep.subr.bf16.mxu1 %v3094_v5  ;;  %2418 = vmatpush3.bf16.msra.mxu0 %v2684_v24  ;;  %v2357_v44 = vld [vmem:[%s3704_s6] ss:$0 sm:$0xff]  ;;  %v769_v56 = vld [vmem:[%s636_s29] sm:$0xff] }
  0xcc   : > { %2419 = vmatprep.subr.bf16.mxu0 %v3094_v5  ;;  %v2358_v50 = vld [vmem:[%s3705_s7] ss:$0 sm:$0xff]  ;;  %v2700_v4 = vld [vmem:[#allocation16 + $0x20] sm:$0xff]  }
  0xcd   : > { %v770_v57 = vld [vmem:[%s636_s29 + $0x8] sm:$0xff] }
  0xce   : > { %2440 = vmatpush3.bf16.msra.mxu1 %v2685_v25  ;;  %v2244_v24 = vld [vmem:[%s3711_s13] ss:$0 sm:$0xff] }
  0xcf   : > { %2420 = vmatpush3.bf16.msra.mxu0 %v2686_v26  ;;  %2441 = vmatprep.subr.bf16.mxu1 %v3094_v5  ;;  %v2253_v25 = vld [vmem:[%s3782_s12] ss:$0 sm:$0xff] }
  0xd0   : > { %2421 = vmatprep.subr.bf16.mxu0 %v3094_v5 }
  0xd2   : > { %2442 = vmatpush3.bf16.msra.mxu1 %v2687_v27 }
  0xd3   : > { %2422 = vmatpush3.bf16.msra.mxu0 %v2688_v28  ;;  %2443 = vmatprep.subr.bf16.mxu1 %v3094_v5 }
  0xd4   : > { %2423 = vmatprep.subr.bf16.mxu0 %v3094_v5 }
  0xd6   : > { %2444 = vmatpush3.bf16.msra.mxu1 %v2689_v29 }
  0xd7   : > { %2424 = vmatpush3.bf16.msra.mxu0 %v2690_v30  ;;  %2445 = vmatprep.subr.bf16.mxu1 %v3094_v5 }
  0xd8   : > { %2425 = vmatprep.subr.bf16.mxu0 %v3094_v5 }
  0xda   : > { %2446 = vmatpush3.bf16.msra.mxu1 %v2691_v31 }
  0xdb   : > { %2426 = vmatpush3.bf16.msra.mxu0 %v2692_v32  ;;  %2447 = vmatprep.subr.bf16.mxu1 %v3094_v5 }
  0xdc   : > { %2427 = vmatprep.subr.bf16.mxu0 %v3094_v5 }
  0xde   : > { %2448 = vmatpush3.bf16.msra.mxu1 %v2693_v33 }
  0xdf   : > { %2428 = vmatpush3.bf16.msra.mxu0 %v2694_v34  ;;  %2449 = vmatprep.subr.bf16.mxu1 %v3094_v5 }
  0xe0   : > { %2429 = vmatprep.subr.bf16.mxu0 %v3094_v5 }
  0xe2   : > { %2450 = vmatpush3.bf16.msra.mxu1 %v2695_v35 }
  0xe3   : > { %2430 = vmatpush3.bf16.msra.mxu0 %v2696_v36  ;;  %2475 = vmatprep.subr.bf16.mxu1 %v3094_v5 }
  0xe4   : > { %2455 = vmatprep.subr.bf16.mxu0 %v3094_v5 }
 0x14d   : > { %v731_v6 = vpop.xlane.xlu0 %730 }
 0x14e   : > { %v1125_v7 = vpop.xlane.xlu1 %1124  ;;  %v735_v8 = vmul.f32 0.0078125, %v731_v6 }
 0x14f   : > { %v1129_v9 = vmul.f32 0.0078125, %v1125_v7 }
 0x150   : > { %v3447_v10 = vsub.f32 %v728_v0, %v735_v8  ;;  %v2697_v0 = vld [vmem:[#allocation16 + $0x38] sm:$0xff]  }
 0x151   : > { %v3449_v11 = vsub.f32 %v1122_v1, %v1129_v9  ;;  %v733_v12 = vpop.xlane.xlu0 %732  ;;  %v2701_v8 = vld [vmem:[#allocation16 + $0x18] sm:$0xff]  }
 0x152   : > { %v1127_v13 = vpop.xlane.xlu1 %1126  ;;  %v736_v14 = vmul.f32 0.0078125, %v733_v12  ;;  %v739_v15 = vmul.f32 %v3447_v10, %v3447_v10  ;;  %v2702_v12 = vld [vmem:[#allocation16 + $0x10] sm:$0xff]  }
 0x153   : > { %v1130_v16 = vmul.f32 0.0078125, %v1127_v13  ;;  %v1133_v19 = vmul.f32 %v3449_v11, %v3449_v11 }
 0x154   : > { %v3453_v17 = vsub.f32 %v729_v2, %v736_v14  ;;  %741 = vadd.xlane.f32.xlu0 %v739_v15  ;;  %v2698_v2 = vld [vmem:[#allocation16 + $0x30] sm:$0xff]   ;;  %v2703_v15 = vld [vmem:[#allocation16 + $0x8] sm:$0xff]  }
 0x155   : > { %v3455_v18 = vsub.f32 %v1123_v3, %v1130_v16  ;;  %v2699_v3 = vld [vmem:[#allocation16 + $0x28] sm:$0xff]  }
 0x156   : > { %v740_v20 = vmul.f32 %v3453_v17, %v3453_v17 }
 0x157   : > { %v1134_v21 = vmul.f32 %v3455_v18, %v3455_v18 }
 0x158   : > { %1135 = vadd.xlane.f32.xlu0 %v1133_v19  ;;  %743 = vadd.xlane.f32.xlu1 %v740_v20  ;;  %v2704_v20 = vld [vmem:[#allocation16] sm:$0xff]  }
 0x15c   : > { %1137 = vadd.xlane.f32.xlu1 %v1134_v21 }
 0x1dd   : > { %v742_v37 = vpop.xlane.xlu0 %741 }
 0x1de   : > { %v745_v38 = vmul.f32 0.0078125, %v742_v37 }
 0x1e0   : > { %v747_v39 = vadd.f32 1e-05, %v745_v38  ;;  %v2280_v38 = vld [vmem:[%s3783_s20] ss:$0 sm:$0xff] }
 0x1e1   : > { %v744_v40 = vpop.xlane.xlu1 %743  ;;  %v1136_v49 = vpop.xlane.xlu0 %1135 }
 0x1e2   : > { %2722 = vrsqrt.f32 %v747_v39  ;;  %v746_v41 = vmul.f32 0.0078125, %v744_v40  ;;  %v1139_v53 = vmul.f32 0.0078125, %v1136_v49 }
 0x1e4   : > { %v748_v42 = vadd.f32 1e-05, %v746_v41  ;;  %v1141_v60 = vadd.f32 1e-05, %v1139_v53 }
 0x1e5   : > { %v1138_v46 = vpop.xlane.xlu1 %1137 }
 0x1e6   : > { %2724 = vrsqrt.f32 %v748_v42  ;;  %v1140_v51 = vmul.f32 0.0078125, %v1138_v46 }
 0x1e8   : > { %v1142_v58 = vadd.f32 1e-05, %v1140_v51 }
 0x1ea   : > { %2726 = vrsqrt.f32 %v1142_v58 }
 0x1eb   : > { %2728 = vrsqrt.f32 %v1141_v60 }
 0x1ef   : > { %v2723_v43 = vpop.eup %2722 }
 0x1f0   : > { %v751_v45 = vmul.f32 %v2723_v43, %v3447_v10 }
 0x1f2   : > { %v759_v47 = vmul.f32 %v2357_v44, %v751_v45 }
 0x1f3   : > { %v2725_v48 = vpop.eup %2724 }
 0x1f4   : > { %v752_v52 = vmul.f32 %v2725_v48, %v3453_v17  ;;  %v767_v55 = vadd.f32 %v2358_v50, %v759_v47  ;;  %v1164_v17 = vld [vmem:[%s627_s15 + $0x8] sm:$0xff] }
 0x1f6   : > { %v760_v54 = vmul.f32 %v2357_v44, %v752_v52  ;;  %v771_v62 = vadd.f32 %v769_v56, %v767_v55 }
 0x1f7   : > { %v2727_v6 = vpop.eup %2726 }
 0x1f8   : > { %v768_v59 = vadd.f32 %v2358_v50, %v760_v54  ;;  %v2729_v7 = vpop.eup %2728  ;;  %v1146_v9 = vmul.f32 %v2727_v6, %v3455_v18  ;;  %v1163_v18 = vld [vmem:[%s627_s15] sm:$0xff]  ;;  %s3098_s15 = smov 32  }
 0x1f9   : > { %v1145_v10 = vmul.f32 %v2729_v7, %v3449_v11 }
 0x1fa   : > { %v886_v61 = vpack.c.bf16 %v768_v59, %v767_v55  ;;  %v772_v63 = vadd.f32 %v770_v57, %v768_v59  ;;  %v1154_v13 = vmul.f32 %v2357_v44, %v1146_v9  ;;  %v754_v59 = vlaneseq }
 0x1fb   : > { %v1153_v14 = vmul.f32 %v2357_v44, %v1145_v10 }
 0x1fc   : > { %2452 = vmatmul.mubr.bf16.vlgmr.msra.gmra.mxu1 %v886_v61  ;;  %v773_v1 = vpack.c.bf16 %v772_v63, %v771_v62  ;;  %v1162_v16 = vadd.f32 %v2358_v50, %v1154_v13  ;;  %v1285_v60 = vand.u32 127, %v754_v59  ;;  %v1286_v61 = vstv %s1283_s21 }
 0x1fd   : > { %2479 = vmatprep.mubr.msk.bf16.mxu1 %vm3095_vm0, %v3094_v5  ;;  %v1161_v19 = vadd.f32 %v2358_v50, %v1153_v14  ;;  %v3096_v62 = vmov -1e+30  }
 0x1fe   : > { %2432 = vmatmul.mubr.bf16.vlgmr.msra.gmra.mxu0 %v773_v1  ;;  %v1166_v11 = vadd.f32 %v1164_v17, %v1162_v16  ;;  %vm1287_vm3 = vcmp.lt.s32.totalorder %v1285_v60, %v1286_v61 }
 0x1ff   : > { %2456 = vmatpush3.bf16.msra.mxu0 %v2697_v0  ;;  %2471 = vmatprep.mubr.msk.bf16.mxu0 %vm3095_vm0, %v3094_v5  ;;  %v1165_v21 = vadd.f32 %v1163_v18, %v1161_v19  ;;  %v3539_v63 = vsel %vm1287_vm3, 0.0, %v3096_v62 }
 0x200   : > { %2457 = vmatprep.subr.bf16.mxu0 %v3094_v5 }
 0x201   : > { %v1167_v22 = vpack.c.bf16 %v1166_v11, %v1165_v21 }
 0x203   : > { %2458 = vmatpush3.bf16.msra.mxu0 %v2698_v2 }
 0x204   : > { %2459 = vmatprep.subr.bf16.mxu0 %v3094_v5 }
 0x207   : > { %2460 = vmatpush3.bf16.msra.mxu0 %v2699_v3 }
 0x208   : > { %2461 = vmatprep.subr.bf16.mxu0 %v3094_v5 }
 0x20b   : > { %2462 = vmatpush3.bf16.msra.mxu0 %v2700_v4 }
 0x20c   : > { %2463 = vmatprep.subr.bf16.mxu0 %v3094_v5 }
 0x20f   : > { %2464 = vmatpush3.bf16.msra.mxu0 %v2701_v8 }
 0x210   : > { %2465 = vmatprep.subr.bf16.mxu0 %v3094_v5 }
 0x213   : > { %2466 = vmatpush3.bf16.msra.mxu0 %v2702_v12 }
 0x214   : > { %2467 = vmatprep.subr.bf16.mxu0 %v3094_v5 }
 0x217   : > { %2468 = vmatpush3.bf16.msra.mxu0 %v2703_v15 }
 0x218   : > { %2469 = vmatprep.subr.bf16.mxu0 %v3094_v5 }
 0x21b   : > { %2470 = vmatpush3.bf16.msra.mxu0 %v2704_v20 }
 0x21c   : > { %2531 = vmatprep.subr.bf16.mxu0 %v3094_v5 }
 0x21e   : > { %2472 = vmatmul.mubr.bf16.vlgmr.msra.gmra.mxu0 %v1167_v22 }
 0x21f   : > { %2547 = vmatprep.mubr.msk.bf16.mxu0 %vm3095_vm0, %v3094_v5 }
 0x2bc   : > { %v992_v23 = vpop.f32.mrf.mxu1 }
 0x2bd   : > { %v993_v31 = vadd.f32 %v2253_v25, %v992_v23 }
 0x2be   : > { %v879_v26 = vpop.f32.mrf.mxu0  ;;  %v2453_v27 = vpop.f32.mrf.mxu1 }
 0x2bf   : > { %v880_v28 = vadd.f32 %v2244_v24, %v879_v26 }
 0x2c0   : > { %v2433_v29 = vpop.f32.mrf.mxu0  ;;  %v995_v30 = vpop.f32.mrf.mxu1 }
 0x2c1   : > { %v996_v32 = vadd.f32 %v2253_v25, %v995_v30  ;;  %999 = vxpose.xlu0.b32.start [1/2] (short) %v880_v28, 128 }
 0x2c2   : > { %v882_v33 = vpop.f32.mrf.mxu0  ;;  %v2454_v34 = vpop.f32.mrf.mxu1 }
 0x2c3   : > { %v2350_v35 = vpack.c.bf16 %v996_v32, %v993_v31  ;;  %v883_v36 = vadd.f32 %v2244_v24, %v882_v33 }
 0x2c4   : > { %v2434_v37 = vpop.f32.mrf.mxu0 }
 0x2c5   : > { %2351 = vst [vmem:[#allocation3] sm:$0xff] %v2350_v35   ;;  %1000 = vxpose.xlu0.b32.end [2/2] (short) %v883_v36, 128 }
 0x2cc   : > { %v3531_v58 = vld [vmem:[#allocation3] sm:$0xff]  }
 0x2de   : > { %v1273_v39 = vpop.f32.mrf.mxu0 }
 0x2df   : > { %v1274_v41 = vadd.f32 %v2280_v38, %v1273_v39 }
 0x2e0   : > { %v2473_v40 = vpop.f32.mrf.mxu0 }
 0x2e1   : > { %v1280_v45 = vmul.f32 0.17677669, %v1274_v41 }
 0x2e2   : > { %v1276_v42 = vpop.f32.mrf.mxu0 }
 0x2e3   : > { %v1277_v43 = vadd.f32 %v2280_v38, %v1276_v42 }
 0x2e4   : > { %v2474_v44 = vpop.f32.mrf.mxu0 }
 0x2e5   : > { %v1281_v46 = vmul.f32 0.17677669, %v1277_v43 }
 0x2e7   : > { %v3523_v47 = vpack.c.bf16 %v1281_v46, %v1280_v45 }
 0x33d   : > { %v1015_v48 = vpop.trf.xlu0 }
 0x33e   : > { %v2326_v49 = vpack.c.bf16 %v1015_v48, %v1015_v48 }
 0x340   : > { %1096 = vst.msk [vmem:[#allocation2] sm:$0xf] %vm1095_vm1, %v2326_v49 }
 0x341   : > { %v1016_v50 = vpop.trf.xlu0 }
 0x342   : > { %v2327_v51 = vpack.c.bf16 %v1016_v50, %v1016_v50 }
 0x344   : > { %1097 = vst.msk [vmem:[#allocation2 + $0x4] sm:$0xf] %vm1095_vm1, %v2327_v51 }
 0x345   : > { %v1017_v52 = vpop.trf.xlu0 }
 0x346   : > { %v2328_v53 = vpack.c.bf16 %v1017_v52, %v1017_v52 }
 0x348   : > { %1098 = vst.msk [vmem:[#allocation2 + $0x8] sm:$0xf] %vm1095_vm1, %v2328_v53 }
 0x349   : > { %v1018_v54 = vpop.trf.xlu0 }
 0x34a   : > { %v2329_v55 = vpack.c.bf16 %v1018_v54, %v1018_v54 }
 0x34b   : > { %v2706_v57 = vld [vmem:[#allocation2] sm:$0xff]  }
 0x34c   : > { %1099 = vst.msk [vmem:[#allocation2 + $0xc] sm:$0xf] %vm1095_vm1, %v2329_v55 }
 0x34d   : > { %v1019_v9 = vpop.trf.xlu0 }
 0x34e   : > { %v2330_v10 = vpack.c.bf16 %v1019_v9, %v1019_v9 }
 0x350   : > { %1100 = vst.msk [vmem:[#allocation2 + $0x10] sm:$0xf] %vm1095_vm1, %v2330_v10 }
 0x351   : > { %v1020_v12 = vpop.trf.xlu0 }
 0x352   : > { %v2331_v13 = vpack.c.bf16 %v1020_v12, %v1020_v12 }
 0x353   : > { %v2705_v56 = vld [vmem:[#allocation2 + $0x8] sm:$0xff]  }
 0x354   : > { %2476 = vmatpush3.bf16.msra.mxu1 %v2705_v56  ;;  %1101 = vst.msk [vmem:[#allocation2 + $0x14] sm:$0xf] %vm1095_vm1, %v2331_v13 }
 0x355   : > { %2477 = vmatprep.subr.bf16.mxu1 %v3094_v5  ;;  %v1021_v23 = vpop.trf.xlu0 }
 0x356   : > { %v2332_v24 = vpack.c.bf16 %v1021_v23, %v1021_v23 }
 0x358   : > { %2478 = vmatpush3.bf16.msra.mxu1 %v2706_v57  ;;  %1102 = vst.msk [vmem:[#allocation2 + $0x18] sm:$0xf] %vm1095_vm1, %v2332_v24 }
 0x359   : > { %2483 = vmatprep.subr.bf16.mxu1 %v3094_v5  ;;  %v1022_v25 = vpop.trf.xlu0 }
 0x35a   : > { %v2333_v26 = vpack.c.bf16 %v1022_v25, %v1022_v25 }
 0x35b   : > { %2480 = vmatmul.mubr.msk.bf16.vlgmr.msra.gmra.mxu1 %vm1319_vm2, %v3523_v47  ;;  %v2709_v35 = vld [vmem:[#allocation2 + $0x10] sm:$0xff]  }
 0x35c   : > { %2484 = vmatpush3.bf16.msra.mxu1 %v3531_v58  ;;  %2485 = vmatprep.mubr.msk.bf16.mxu1 %vm3095_vm0, %v3094_v5  ;;  %1103 = vst.msk [vmem:[#allocation2 + $0x1c] sm:$0xf] %vm1095_vm1, %v2333_v26 }
 0x35d   : > { %2489 = vmatprep.subr.bf16.mxu1 %v3094_v5  ;;  %v1023_v37 = vpop.trf.xlu0 }
 0x35e   : > { %v2334_v38 = vpack.c.bf16 %v1023_v37, %v1023_v37 }
 0x360   : > { %1104 = vst.msk [vmem:[#allocation2 + $0x20] sm:$0xf] %vm1095_vm1, %v2334_v38 }
 0x361   : > { %v1024_v39 = vpop.trf.xlu0 }
 0x362   : > { %v2335_v40 = vpack.c.bf16 %v1024_v39, %v1024_v39 }
 0x363   : > { %v2708_v34 = vld [vmem:[#allocation2 + $0x18] sm:$0xff]  }
 0x364   : > { %1105 = vst.msk [vmem:[#allocation2 + $0x24] sm:$0xf] %vm1095_vm1, %v2335_v40 }
 0x365   : > { %v1025_v41 = vpop.trf.xlu0 }
 0x366   : > { %v2336_v42 = vpack.c.bf16 %v1025_v41, %v1025_v41 }
 0x368   : > { %1106 = vst.msk [vmem:[#allocation2 + $0x28] sm:$0xf] %vm1095_vm1, %v2336_v42 }
 0x369   : > { %v1026_v43 = vpop.trf.xlu0 }
 0x36a   : > { %v2337_v44 = vpack.c.bf16 %v1026_v43, %v1026_v43 }
 0x36c   : > { %1107 = vst.msk [vmem:[#allocation2 + $0x2c] sm:$0xf] %vm1095_vm1, %v2337_v44 }
 0x36d   : > { %v1027_v45 = vpop.trf.xlu0 }
 0x36e   : > { %v2338_v46 = vpack.c.bf16 %v1027_v45, %v1027_v45 }
 0x370   : > { %1108 = vst.msk [vmem:[#allocation2 + $0x30] sm:$0xf] %vm1095_vm1, %v2338_v46 }
 0x371   : > { %v1028_v48 = vpop.trf.xlu0 }
 0x372   : > { %v2339_v49 = vpack.c.bf16 %v1028_v48, %v1028_v48 }
 0x373   : > { %v2710_v23 = vld [vmem:[#allocation2 + $0x28] sm:$0xff]  }
 0x374   : > { %1109 = vst.msk [vmem:[#allocation2 + $0x34] sm:$0xf] %vm1095_vm1, %v2339_v49 }
 0x375   : > { %v1029_v50 = vpop.trf.xlu0 }
 0x376   : > { %v2340_v51 = vpack.c.bf16 %v1029_v50, %v1029_v50 }
 0x378   : > { %1110 = vst.msk [vmem:[#allocation2 + $0x38] sm:$0xf] %vm1095_vm1, %v2340_v51 }
 0x379   : > { %v1030_v52 = vpop.trf.xlu0 }
 0x37a   : > { %v2341_v53 = vpack.c.bf16 %v1030_v52, %v1030_v52 }
 0x37c   : > { %1111 = vst.msk [vmem:[#allocation2 + $0x3c] sm:$0xf] %vm1095_vm1, %v2341_v53 }
 0x41b   : > { %v1357_v0 = vpop.f32.mrf.mxu1 }
 0x41c   : > { %v1358_v1 = vadd.f32 %v1357_v0, %v3539_v63 }
 0x41d   : > { %v2481_v2 = vpop.f32.mrf.mxu1 }
 0x41e   : > { %v1365_v3 = vsel %vm1364_vm4, %v1358_v1, -inf }
 0x41f   : > { %1366 = vmax.xlane.f32.xlu1 %v1365_v3  ;;  %v1360_v4 = vpop.f32.mrf.mxu1 }
 0x420   : > { %v1361_v6 = vadd.f32 %v1360_v4, %v3539_v63 }
 0x421   : > { %v2482_v7 = vpop.f32.mrf.mxu1 }
 0x422   : > { %v1368_v8 = vsel %vm1364_vm4, %v1361_v6, -inf }
 0x423   : > { %1369 = vmax.xlane.f32.xlu1 %v1368_v8 }
 0x4a8   : > { %v1367_v14 = vpop.xlane.xlu1 %1366 }
 0x4a9   : > { %v1371_v15 = vsub.f32 %v1358_v1, %v1367_v14 }
 0x4ab   : > { %v1373_v16 = vmul.f32 1.442695, %v1371_v15 }
 0x4ac   : > { %v1370_v17 = vpop.xlane.xlu1 %1369 }
 0x4ad   : > { %2730 = vpow2.f32 %v1373_v16  ;;  %v1372_v19 = vsub.f32 %v1361_v6, %v1370_v17 }
 0x4af   : > { %v1375_v20 = vmul.f32 1.442695, %v1372_v19 }
 0x4b1   : > { %2732 = vpow2.f32 %v1375_v20 }
 0x4ba   : > { %v2731_v18 = vpop.eup %2730 }
 0x4bb   : > { %v1377_v11 = vsel %vm1364_vm4, %v2731_v18, 0.0 }
 0x4bc   : > { %1378 = vadd.xlane.f32.xlu1 %v1377_v11 }
 0x4be   : > { %v2733_v21 = vpop.eup %2732 }
 0x4bf   : > { %v1380_v22 = vsel %vm1364_vm4, %v2733_v21, 0.0 }
 0x4c0   : > { %1381 = vadd.xlane.f32.xlu1 %v1380_v22 }
 0x4d1   : > { %1441 = vrot.lane.b32.xlu1 %v3523_v47, %s3097_s3 }
 0x545   : > { %v1379_v27 = vpop.xlane.xlu1 %1378 }
 0x546   : > { %2734 = vrcp.f32 %v1379_v27 }
 0x549   : > { %v1382_v28 = vpop.xlane.xlu1 %1381 }
 0x54a   : > { %2736 = vrcp.f32 %v1382_v28 }
 0x54d   : > { %v1442_v36 = vpop.permute.xlu1 %1441 }
 0x553   : > { %v2735_v29 = vpop.eup %2734 }
 0x554   : > { %v1385_v31 = vmul.f32 %v2735_v29, %v2731_v18 }
 0x557   : > { %v2737_v30 = vpop.eup %2736 }
 0x558   : > { %v1386_v32 = vmul.f32 %v2737_v30, %v2733_v21 }
 0x55a   : > { %v1387_v33 = vpack.c.bf16 %v1386_v32, %v1385_v31 }
 0x55c   : > { %2486 = vmatmul.mubr.msk.bf16.vlgmr.msra.gmra.mxu1 %vm1364_vm4, %v1387_v33 }
 0x55d   : > { %2490 = vmatpush3.bf16.msra.mxu1 %v2708_v34  ;;  %2493 = vmatprep.mubr.msk.bf16.mxu1 %vm3095_vm0, %v3094_v5 }
 0x55e   : > { %2491 = vmatprep.subr.bf16.mxu1 %v3094_v5 }
 0x561   : > { %2492 = vmatpush3.bf16.msra.mxu1 %v2709_v35 }
 0x562   : > { %2497 = vmatprep.subr.bf16.mxu1 %v3094_v5 }
 0x564   : > { %2494 = vmatmul.mubr.msk.bf16.vlgmr.msra.gmra.mxu1 %vm1319_vm2, %v1442_v36 }
 0x565   : > { %2499 = vmatprep.mubr.msk.bf16.mxu1 %vm3095_vm0, %v3094_v5 }
 0x61c   : > { %v1431_v54 = vpop.f32.mrf.mxu1 }
 0x61d   : > { %1438 = vst.msk [vmem:[#allocation4] sm:$0xff] %vm1319_vm2, %v1431_v54 }
 0x61e   : > { %v2487_v55 = vpop.f32.mrf.mxu1 }
 0x620   : > { %v1434_v56 = vpop.f32.mrf.mxu1 }
 0x621   : > { %1439 = vst.msk [vmem:[#allocation4 + $0x8] sm:$0xff] %vm1319_vm2, %v1434_v56  ;;  %v2712_v56 = vld [vmem:[#allocation2 + $0x38] sm:$0xff]  }
 0x622   : > { %v2488_v57 = vpop.f32.mrf.mxu1 }
 0x623   : > { %v2713_v57 = vld [vmem:[#allocation2 + $0x30] sm:$0xff]  }
 0x624   : > { %v1492_v59 = vpop.f32.mrf.mxu1 }
 0x625   : > { %v1493_v60 = vadd.f32 %v1492_v59, %v3539_v63 }
 0x626   : > { %v2495_v61 = vpop.f32.mrf.mxu1 }
 0x627   : > { %v1499_v62 = vsel %vm1364_vm4, %v1493_v60, -inf }
 0x628   : > { %1500 = vmax.xlane.f32.xlu1 %v1499_v62  ;;  %v1495_v0 = vpop.f32.mrf.mxu1 }
 0x629   : > { %v1496_v1 = vadd.f32 %v1495_v0, %v3539_v63 }
 0x62a   : > { %v2496_v2 = vpop.f32.mrf.mxu1 }
 0x62b   : > { %v1502_v3 = vsel %vm1364_vm4, %v1496_v1, -inf }
 0x62c   : > { %1503 = vmax.xlane.f32.xlu0 %v1502_v3 }
 0x642   : > { %1719 = vrot.lane.b32.xlu0 %v3523_v47, %s3098_s15 }
 0x6b1   : > { %v1501_v4 = vpop.xlane.xlu1 %1500 }
 0x6b2   : > { %v1505_v6 = vsub.f32 %v1493_v60, %v1501_v4 }
 0x6b4   : > { %v1507_v7 = vmul.f32 1.442695, %v1505_v6 }
 0x6b5   : > { %v1504_v8 = vpop.xlane.xlu0 %1503 }
 0x6b6   : > { %2738 = vpow2.f32 %v1507_v7  ;;  %v1506_v9 = vsub.f32 %v1496_v1, %v1504_v8 }
 0x6b8   : > { %v1509_v10 = vmul.f32 1.442695, %v1506_v9 }
 0x6b9   : > { %v1720_v59 = vpop.permute.xlu0 %1719 }
 0x6ba   : > { %2740 = vpow2.f32 %v1509_v10 }
 0x6c3   : > { %v2739_v12 = vpop.eup %2738 }
 0x6c4   : > { %v1511_v13 = vsel %vm1364_vm4, %v2739_v12, 0.0 }
 0x6c5   : > { %1512 = vadd.xlane.f32.xlu1 %v1511_v13 }
 0x6c7   : > { %v2741_v14 = vpop.eup %2740 }
 0x6c8   : > { %v1514_v15 = vsel %vm1364_vm4, %v2741_v14, 0.0 }
 0x6c9   : > { %1515 = vadd.xlane.f32.xlu1 %v1514_v15 }
 0x6da   : > { %1522 = vrot.lane.b32.xlu1 %v3531_v58, %s3097_s3 }
 0x6de   : > { %1580 = vrot.lane.b32.xlu1 %v3523_v47, %s3099_s8  ;;  %v2711_v47 = vld [vmem:[#allocation2 + $0x20] sm:$0xff]  }
 0x74e   : > { %v1513_v16 = vpop.xlane.xlu1 %1512 }
 0x74f   : > { %2742 = vrcp.f32 %v1513_v16 }
 0x752   : > { %v1516_v17 = vpop.xlane.xlu1 %1515 }
 0x753   : > { %2744 = vrcp.f32 %v1516_v17 }
 0x756   : > { %v1523_v19 = vpop.permute.xlu1 %1522 }
 0x757   : > { %2498 = vmatpush3.bf16.msra.mxu1 %v1523_v19 }
 0x758   : > { %2503 = vmatprep.subr.bf16.mxu1 %v3094_v5 }
 0x75a   : > { %v1581_v24 = vpop.permute.xlu1 %1580 }
 0x75c   : > { %v2743_v20 = vpop.eup %2742 }
 0x75d   : > { %v1519_v11 = vmul.f32 %v2743_v20, %v2739_v12 }
 0x760   : > { %v2745_v18 = vpop.eup %2744 }
 0x761   : > { %v1520_v21 = vmul.f32 %v2745_v18, %v2741_v14 }
 0x763   : > { %v1521_v22 = vpack.c.bf16 %v1520_v21, %v1519_v11 }
 0x765   : > { %2500 = vmatmul.mubr.msk.bf16.vlgmr.msra.gmra.mxu1 %vm1364_vm4, %v1521_v22 }
 0x766   : > { %2504 = vmatpush3.bf16.msra.mxu1 %v2710_v23  ;;  %2507 = vmatprep.mubr.msk.bf16.mxu1 %vm3095_vm0, %v3094_v5 }
 0x767   : > { %2505 = vmatprep.subr.bf16.mxu1 %v3094_v5 }
 0x76a   : > { %2506 = vmatpush3.bf16.msra.mxu1 %v2711_v47 }
 0x76b   : > { %2511 = vmatprep.subr.bf16.mxu1 %v3094_v5 }
 0x76d   : > { %2508 = vmatmul.mubr.msk.bf16.vlgmr.msra.gmra.mxu1 %vm1319_vm2, %v1581_v24 }
 0x76e   : > { %2513 = vmatprep.mubr.msk.bf16.mxu1 %vm3095_vm0, %v3094_v5 }
 0x825   : > { %v3592_v25 = vpop.f32.mrf.mxu1 }
 0x827   : > { %v2501_v26 = vpop.f32.mrf.mxu1 }
 0x829   : > { %v3594_v27 = vpop.f32.mrf.mxu1 }
 0x82b   : > { %v2502_v28 = vpop.f32.mrf.mxu1 }
 0x82d   : > { %v1631_v29 = vpop.f32.mrf.mxu1 }
 0x82e   : > { %v1632_v30 = vadd.f32 %v1631_v29, %v3539_v63  ;;  %v2714_v29 = vld [vmem:[#allocation20 + $0x38] sm:$0xff]  }
 0x82f   : > { %v2509_v31 = vpop.f32.mrf.mxu1  ;;  %2532 = vmatpush3.bf16.msra.mxu0 %v2714_v29 }
 0x830   : > { %v1638_v32 = vsel %vm1364_vm4, %v1632_v30, -inf  ;;  %2533 = vmatprep.subr.bf16.mxu0 %v3094_v5  ;;  %v2716_v31 = vld [vmem:[#allocation20 + $0x28] sm:$0xff]  }
 0x831   : > { %1639 = vmax.xlane.f32.xlu1 %v1638_v32  ;;  %v1634_v33 = vpop.f32.mrf.mxu1  ;;  %v2717_v32 = vld [vmem:[#allocation20 + $0x20] sm:$0xff]  }
 0x832   : > { %v1635_v34 = vadd.f32 %v1634_v33, %v3539_v63  ;;  %v2718_v33 = vld [vmem:[#allocation20 + $0x18] sm:$0xff]  }
 0x833   : > { %v2510_v35 = vpop.f32.mrf.mxu1 }
 0x834   : > { %v1641_v36 = vsel %vm1364_vm4, %v1635_v34, -inf  ;;  %v2720_v35 = vld [vmem:[#allocation20 + $0x8] sm:$0xff]  }
 0x835   : > { %1642 = vmax.xlane.f32.xlu1 %v1641_v36  ;;  %v2721_v36 = vld [vmem:[#allocation20] sm:$0xff]  }
 0x8ba   : > { %v1640_v37 = vpop.xlane.xlu1 %1639 }
 0x8bb   : > { %v1644_v38 = vsub.f32 %v1632_v30, %v1640_v37  ;;  %v2715_v30 = vld [vmem:[#allocation20 + $0x30] sm:$0xff]  }
 0x8bc   : > { %2534 = vmatpush3.bf16.msra.mxu0 %v2715_v30 }
 0x8bd   : > { %v1646_v39 = vmul.f32 1.442695, %v1644_v38  ;;  %2535 = vmatprep.subr.bf16.mxu0 %v3094_v5 }
 0x8be   : > { %v1643_v40 = vpop.xlane.xlu1 %1642 }
 0x8bf   : > { %2746 = vpow2.f32 %v1646_v39  ;;  %v1645_v41 = vsub.f32 %v1635_v34, %v1643_v40  ;;  %v2719_v34 = vld [vmem:[#allocation20 + $0x10] sm:$0xff]  }
 0x8c0   : > { %2536 = vmatpush3.bf16.msra.mxu0 %v2716_v31 }
 0x8c1   : > { %v1648_v42 = vmul.f32 1.442695, %v1645_v41  ;;  %2537 = vmatprep.subr.bf16.mxu0 %v3094_v5 }
 0x8c3   : > { %2748 = vpow2.f32 %v1648_v42 }
 0x8c4   : > { %2538 = vmatpush3.bf16.msra.mxu0 %v2717_v32 }
 0x8c5   : > { %2539 = vmatprep.subr.bf16.mxu0 %v3094_v5 }
 0x8c8   : > { %2540 = vmatpush3.bf16.msra.mxu0 %v2718_v33 }
 0x8c9   : > { %2541 = vmatprep.subr.bf16.mxu0 %v3094_v5 }
 0x8cc   : > { %v2747_v43 = vpop.eup %2746  ;;  %2542 = vmatpush3.bf16.msra.mxu0 %v2719_v34 }
 0x8cd   : > { %v1650_v44 = vsel %vm1364_vm4, %v2747_v43, 0.0  ;;  %2543 = vmatprep.subr.bf16.mxu0 %v3094_v5 }
 0x8ce   : > { %1651 = vadd.xlane.f32.xlu1 %v1650_v44 }
 0x8d0   : > { %v2749_v45 = vpop.eup %2748  ;;  %2544 = vmatpush3.bf16.msra.mxu0 %v2720_v35 }
 0x8d1   : > { %v1653_v46 = vsel %vm1364_vm4, %v2749_v45, 0.0  ;;  %2545 = vmatprep.subr.bf16.mxu0 %v3094_v5 }
 0x8d2   : > { %1654 = vadd.xlane.f32.xlu1 %v1653_v46 }
 0x8d4   : > { %2546 = vmatpush3.bf16.msra.mxu0 %v2721_v36 }
 0x8e3   : > { %1661 = vrot.lane.b32.xlu1 %v3531_v58, %s3099_s8 }
 0x957   : > { %v1652_v48 = vpop.xlane.xlu1 %1651 }
 0x958   : > { %2750 = vrcp.f32 %v1652_v48 }
 0x95b   : > { %v1655_v49 = vpop.xlane.xlu1 %1654 }
 0x95c   : > { %2752 = vrcp.f32 %v1655_v49 }
 0x95f   : > { %v1662_v50 = vpop.permute.xlu1 %1661 }
 0x960   : > { %2512 = vmatpush3.bf16.msra.mxu1 %v1662_v50 }
 0x961   : > { %2517 = vmatprep.subr.bf16.mxu1 %v3094_v5 }
 0x965   : > { %v2751_v51 = vpop.eup %2750 }
 0x966   : > { %v1658_v53 = vmul.f32 %v2751_v51, %v2747_v43 }
 0x969   : > { %v2753_v52 = vpop.eup %2752 }
 0x96a   : > { %v1659_v54 = vmul.f32 %v2753_v52, %v2749_v45  ;;  %v2306_v45 = vld [vmem:[%s3784_s9] ss:$0 sm:$0xff] }
 0x96c   : > { %v1660_v55 = vpack.c.bf16 %v1659_v54, %v1658_v53  ;;  %v2762_v53 = vld [vmem:[%s3409_s17] sm:$0xff] }
 0x96e   : > { %2514 = vmatmul.mubr.msk.bf16.vlgmr.msra.gmra.mxu1 %vm1364_vm4, %v1660_v55  ;;  %v2763_v55 = vld [vmem:[%s3409_s17 + $0x8] sm:$0xff] }
 0x96f   : > { %2518 = vmatpush3.bf16.msra.mxu1 %v2712_v56  ;;  %2521 = vmatprep.mubr.msk.bf16.mxu1 %vm3095_vm0, %v3094_v5 }
 0x970   : > { %2519 = vmatprep.subr.bf16.mxu1 %v3094_v5 }
 0x973   : > { %2520 = vmatpush3.bf16.msra.mxu1 %v2713_v57 }
 0x974   : > { %2525 = vmatprep.subr.bf16.mxu1 %v3094_v5 }
 0x976   : > { %2522 = vmatmul.mubr.msk.bf16.vlgmr.msra.gmra.mxu1 %vm1319_vm2, %v1720_v59 }
 0x977   : > { %2527 = vmatprep.mubr.msk.bf16.mxu1 %vm3095_vm0, %v3094_v5 }
 0xa2e   : > { %v1701_v60 = vpop.f32.mrf.mxu1 }
 0xa30   : > { %v2515_v61 = vpop.f32.mrf.mxu1 }
 0xa32   : > { %v1704_v62 = vpop.f32.mrf.mxu1 }
 0xa34   : > { %v2516_v0 = vpop.f32.mrf.mxu1 }
 0xa36   : > { %v1770_v1 = vpop.f32.mrf.mxu1 }
 0xa37   : > { %v1771_v2 = vadd.f32 %v1770_v1, %v3539_v63 }
 0xa38   : > { %v2523_v3 = vpop.f32.mrf.mxu1 }
 0xa39   : > { %v1777_v4 = vsel %vm1364_vm4, %v1771_v2, -inf }
 0xa3a   : > { %1778 = vmax.xlane.f32.xlu1 %v1777_v4  ;;  %v1773_v6 = vpop.f32.mrf.mxu1 }
 0xa3b   : > { %v1774_v7 = vadd.f32 %v1773_v6, %v3539_v63 }
 0xa3c   : > { %v2524_v8 = vpop.f32.mrf.mxu1 }
 0xa3d   : > { %v1780_v9 = vsel %vm1364_vm4, %v1774_v7, -inf }
 0xa3e   : > { %1781 = vmax.xlane.f32.xlu0 %v1780_v9 }
 0xac3   : > { %v1779_v10 = vpop.xlane.xlu1 %1778 }
 0xac4   : > { %v1783_v12 = vsub.f32 %v1771_v2, %v1779_v10 }
 0xac6   : > { %v1785_v13 = vmul.f32 1.442695, %v1783_v12 }
 0xac7   : > { %v1782_v14 = vpop.xlane.xlu0 %1781 }
 0xac8   : > { %2754 = vpow2.f32 %v1785_v13  ;;  %v1784_v15 = vsub.f32 %v1774_v7, %v1782_v14 }
 0xaca   : > { %v1787_v16 = vmul.f32 1.442695, %v1784_v15 }
 0xacc   : > { %2756 = vpow2.f32 %v1787_v16 }
 0xad5   : > { %v2755_v17 = vpop.eup %2754 }
 0xad6   : > { %v1789_v19 = vsel %vm1364_vm4, %v2755_v17, 0.0 }
 0xad7   : > { %1790 = vadd.xlane.f32.xlu1 %v1789_v19 }
 0xad9   : > { %v2757_v20 = vpop.eup %2756 }
 0xada   : > { %v1792_v18 = vsel %vm1364_vm4, %v2757_v20, 0.0 }
 0xadb   : > { %1793 = vadd.xlane.f32.xlu0 %v1792_v18 }
 0xae8   : > { %1800 = vrot.lane.b32.xlu1 %v3531_v58, %s3098_s15 }
 0xaec   : > { %1573 = vrot.lane.b32.xlu1 %v3594_v27, %s3098_s15 }
 0xaf0   : > { %1710 = vrot.lane.b32.xlu1 %v1701_v60, %s3099_s8 }
 0xaf1   : > { %1571 = vrot.lane.b32.xlu0 %v3592_v25, %s3098_s15 }
 0xaf4   : > { %1712 = vrot.lane.b32.xlu1 %v1704_v62, %s3099_s8 }
 0xb60   : > { %v1791_v63 = vpop.xlane.xlu1 %1790 }
 0xb61   : > { %2758 = vrcp.f32 %v1791_v63 }
 0xb64   : > { %v1801_v11 = vpop.permute.xlu1 %1800  ;;  %v1794_v21 = vpop.xlane.xlu0 %1793 }
 0xb65   : > { %2760 = vrcp.f32 %v1794_v21  ;;  %2526 = vmatpush3.bf16.msra.mxu1 %v1801_v11 }
 0xb68   : > { %v1574_v22 = vpop.permute.xlu1 %1573  ;;  %v1572_v23 = vpop.permute.xlu0 %1571 }
 0xb69   : > { %1579 = vst.msk [vmem:[#allocation4 + $0x8] sm:$0xff] %vm1577_vm5, %v1574_v22  ;;  %1578 = vst.msk [vmem:[#allocation4] sm:$0xff] %vm1577_vm5, %v1572_v23 }
 0xb6c   : > { %v1711_v58 = vpop.permute.xlu1 %1710 }
 0xb6d   : > { %1717 = vst.msk [vmem:[#allocation4] sm:$0xff] %vm1716_vm6, %v1711_v58 }
 0xb6e   : > { %v2759_v47 = vpop.eup %2758 }
 0xb6f   : > { %v1797_v26 = vmul.f32 %v2759_v47, %v2755_v17 }
 0xb70   : > { %v1713_v24 = vpop.permute.xlu1 %1712 }
 0xb71   : > { %1718 = vst.msk [vmem:[#allocation4 + $0x8] sm:$0xff] %vm1716_vm6, %v1713_v24 }
 0xb72   : > { %v2761_v25 = vpop.eup %2760 }
 0xb73   : > { %v1798_v27 = vmul.f32 %v2761_v25, %v2757_v20 }
 0xb75   : > { %v1799_v28 = vpack.c.bf16 %v1798_v27, %v1797_v26 }
 0xb77   : > { %2528 = vmatmul.mubr.msk.bf16.vlgmr.msra.gmra.mxu1 %vm1364_vm4, %v1799_v28 }
 0xc37   : > { %v1840_v37 = vpop.f32.mrf.mxu1 }
 0xc38   : > { %1849 = vrot.lane.b32.xlu0 %v1840_v37, %s3097_s3 }
 0xc39   : > { %v2529_v38 = vpop.f32.mrf.mxu1 }
 0xc3b   : > { %v1843_v39 = vpop.f32.mrf.mxu1 }
 0xc3c   : > { %1851 = vrot.lane.b32.xlu1 %v1843_v39, %s3097_s3 }
 0xc3d   : > { %v2530_v40 = vpop.f32.mrf.mxu1 }
 0xcaa   : > { %v1850_v41 = vpop.permute.xlu0 %1849 }
 0xcab   : > { %1856 = vst.msk [vmem:[#allocation4] sm:$0xff] %vm1855_vm7, %v1850_v41 }
 0xcae   : > { %v1852_v42 = vpop.permute.xlu1 %1851 }
 0xcaf   : > { %1857 = vst.msk [vmem:[#allocation4 + $0x8] sm:$0xff] %vm1855_vm7, %v1852_v42 }
 0xcb2   : > { %v1858_v43 = vld [vmem:[#allocation4] sm:$0xff] }
 0xcb6   : > { %v1859_v44 = vld [vmem:[#allocation4 + $0x8] sm:$0xff] }
 0xcb7   : > { %v1860_v5 = vpack.c.bf16 %v1859_v44, %v1858_v43 }
 0xcb9   : > { %2548 = vmatmul.mubr.bf16.vlgmr.msra.gmra.mxu0 %v1860_v5 }
 0xd79   : > { %v1966_v46 = vpop.f32.mrf.mxu0 }
 0xd7a   : > { %v1967_v49 = vadd.f32 %v2306_v45, %v1966_v46 }
 0xd7b   : > { %v2549_v48 = vpop.f32.mrf.mxu0 }
 0xd7c   : > { %v1973_v54 = vadd.f32 %v2762_v53, %v1967_v49 }
 0xd7d   : > { %v1969_v50 = vpop.f32.mrf.mxu0 }
 0xd7e   : > { %v1970_v51 = vadd.f32 %v2306_v45, %v1969_v50 }
 0xd7f   : > { %v2550_v52 = vpop.f32.mrf.mxu0 }
 0xd80   : > { %v1974_v56 = vadd.f32 %v2763_v55, %v1970_v51 }
 0xd82   : > { %v2355_v57 = vpack.c.bf16 %v1974_v56, %v1973_v54 }
 0xd84   : > { %2356 = vst [vmem:[%s3440_s22] sm:$0xff] %v2355_v57  }
 0xd85 PF: > { %s3785_s0 = sld [smem:[#allocation31_spill]]  ;;  %s2003_s26 = sshll.u32 %s3440_s22, 4  ;;  %s3650_s26 = int_to_ptr.vmem [resolvable:$true] %s2003_s26 }
 0xd86   : > { %s3786_s23 = sld [smem:[#allocation35_spill]]  ;;  %s1986_s17 = scalar_lea.sflag [#allocation10], %s3402_s30 }
 0xd87   : > { %s3787_s10 = sld [smem:[#allocation46_spill]]  ;;  %s2980_s12 = scalar_lea.vmem %s3650_s26, 128 }
 0xd88   : > { %p2981_p12 = scmp.ne.s32.totalorder %s3650_s26, %s2980_s12  ;;  %s3100_s24 = smov [#allocation22]  }
 0xd89   : > { %s2984_s2 = sshll.u32 %s3100_s24, 4  ;;  %s2985_s2 = int_to_ptr.vmem [resolvable:$false] %s2984_s2 }
 0xd8a   : > { %s2986_s20 = scalar_lea.vmem %s2985_s2, 256  ;;  %p2987_p2 = scmp.lt.s32.totalorder %s3650_s26, %s2985_s2 }
 0xd8b   : > { %s2346_s16 = sshll.u32 %s3785_s0, 7  ;;  %p2988_p6 = scmp.lt.s32.totalorder %s2986_s20, %s2980_s12 }
 0xd8c   : > { %p3788_p0 = scmp.ne.s32.totalorder %s3786_s23, 0 }
 0xd8d   : > { %s3647_s14 = scalar_lea.hbm %s3787_s10, %s2346_s16  ;;  %p2989_p7 = por %p2988_p6, %p2987_p2 }
 0xd8e   : > { %p2982_p10 = pnand %p2981_p12, %p3788_p0 }
 0xd90   : > { %p2983_p5 = pneg %p2982_p10 }
 0xd92   : > { %p2990_p1 = pnand %p2989_p7, %p2983_p5 }
 0xd94   : > { %2993 = shalt.err (!%p2990_p1)
}
 0xd95   : > { %s2994_s22 = scalar_lea.hbm %s3647_s14, 128  ;;  %s2998_s15 = scalar_lea.hbm %s3787_s10, 256 }
 0xd96   : > { %p2995_p8 = scmp.ne.s32.totalorder %s3647_s14, %s2994_s22  ;;  %p2999_p11 = scmp.lt.s32.totalorder %s3647_s14, %s3787_s10 }
 0xd97   : > { %p3000_p13 = scmp.lt.s32.totalorder %s2998_s15, %s2994_s22 }
 0xd98   : > { %p2996_p3 = pnand %p2995_p8, %p3788_p0 }
 0xd99   : > { %p3001_p4 = por %p3000_p13, %p2999_p11 }
 0xd9a   : > { %p2997_p9 = pneg %p2996_p3 }
 0xd9c   : > { %p3002_p12 = pnand %p3001_p4, %p2997_p9 }
 0xd9e   : > { %3005 = shalt.err (!%p3002_p12)
}
 0xd9f   : > { %s3101_s18 = smov 64   ;;  %s3102_s9 = smov 4  }
 0xda0   : > { %2575 = dma.vmem_to_hbm [thread:$0]  (%p3788_p0), %s3650_s26, 128, %s3647_s14, %s1986_s17, %s3101_s18, %s3101_s18, %s3102_s9  }
 0xda1 PF: > { %s3789_s0 = sld [smem:[#allocation30_spill]]  ;;  %p3792_p5 = scmp.ge.s32.totalorder %s3080_s1, 2 }
 0xda2   : > { %s3790_s16 = sld [smem:[#allocation33_spill]] }
 0xda7   : > { %s2018_s19 = sand.u32 1, %s3789_s0  }
 0xda8   : > { %p3791_p10 = scmp.ne.s32.totalorder %s3790_s16, 0  ;;  %s2019_s25 = scalar_lea.sflag [#allocation10], %s2018_s19 }
 0xdaa   : > { %p2604_p2 = pnand %p3792_p5, %p3791_p10 }
 0xdac   : > { %p2605_p6 = pneg %p2604_p2 }
 0xdae   : > { %3055 = dma.done.wait (%p2605_p6), %s2019_s25, 128  }
 0xdaf   : > { %3057 = vsyncadd (%p2605_p6), %s2019_s25, 4294967168  ;;  %s42_s1 = sadd.s32 1, %s3080_s1   ;;  %s3793_s23 = sld [smem:[#allocation36_spill]] }
 0xdb0   : > { %p39_p7 = scmp.ge.s32.totalorder %s42_s1, 4   ;;  %s3794_s29 = sld [smem:[#allocation32_spill]] }
 0xdb1   : > { %s3795_s30 = sld [smem:[#allocation34_spill]]  ;;  %s3796_s26 = smov %s3064_s27 }
 0xdb2   : > { %s3797_s27 = smov %s3068_s28  ;;  %41 = sbr.rel (!%p39_p7) target bundleno = 30 (0x1e), region = 182 }
 0xdb5   : > { %s3798_s28 = smov %s3793_s23 }
 0xdb7   :  { %2024 = vsyncpa [#allocation9], 1 }
 0xdb8   :  { %2026 = vsyncpa [#allocation9 + $0x1], 1 }
 0xdb9   :  { %2027 = vsyncpa [#allocation12], 1 }
 0xdba   :  { %2029 = vsyncpa [#allocation12 + $0x1], 1 }
 0xdbb   :  { %2030 = vsyncpa [#allocation15], 1 }
 0xdbc   :  { %2032 = vsyncpa [#allocation15 + $0x1], 1 }
 0xdbd   :  { %2033 = vsyncpa [#allocation18], 1 }
 0xdbe   :  { %2034 = vsyncpa [#allocation21], 1 }
 0xdbf   :  { %2035 = vsyncpa [#allocation10], 1 }
 0xdc0   :  { %2037 = vsyncpa [#allocation10 + $0x1], 1 }

</bundles_post_ra>
